<compile_context>
chip_gen: v7x
topology: tpu7x:2x2x1
jax: 0.10.0
libtpu: 0.0.40
codegen_flags: <defaults>
</compile_context>

<pallas_src>
import functools

import jax
import jax.numpy as jnp
from jax.experimental import pallas as pl
from jax.experimental.pallas import tpu as pltpu

BN_EPS = 1e-5


def _conv_accum(x_ref, w_ref, *, oh, ow, kh, kw, stride):
    """Fused-im2col conv for one image.

    x_ref: [1, Hp, Wp, C]   spatially pre-padded NHWC image block
    w_ref: [KH*KW, C, OCp]  weight taps (OC zero-padded to lane width)
    returns f32 [OH*OW, OCp]
    """
    x = x_ref[0]                      # [Hp, Wp, C]
    c = x.shape[-1]
    ocp = w_ref.shape[-1]
    acc = jnp.zeros((oh * ow, ocp), jnp.float32)
    for i in range(kh):               # static unroll over kernel taps
        for j in range(kw):
            patch = jax.lax.slice(
                x,
                (i, j, 0),
                (i + (oh - 1) * stride + 1, j + (ow - 1) * stride + 1, c),
                (stride, stride, 1),
            )                                         # [OH, OW, C]
            lhs = patch.reshape(oh * ow, c)           # [OH*OW, C]
            acc = acc + jnp.dot(lhs, w_ref[i * kw + j],
                                preferred_element_type=jnp.float32)
    return acc


def conv_stats_kernel(x_ref, w_ref, stats_ref, *, oh, ow, kh, kw, stride):
    """Pass 1: per-image per-channel sum and sum-of-squares of the conv output."""
    y = _conv_accum(x_ref, w_ref, oh=oh, ow=ow, kh=kh, kw=kw, stride=stride)
    s = jnp.sum(y, axis=0, keepdims=True)             # [1, OCp]
    sq = jnp.sum(y * y, axis=0, keepdims=True)        # [1, OCp]
    stats_ref[0] = jnp.concatenate([s, sq], axis=0)   # [2, OCp]


def conv_bn_kernel(x_ref, w_ref, scale_ref, shift_ref, o_ref,
                   *, oh, ow, kh, kw, stride, oc):
    """Pass 2: conv + fused BN affine, written channel-major (lane-dense last dim)."""
    y = _conv_accum(x_ref, w_ref, oh=oh, ow=ow, kh=kh, kw=kw, stride=stride)
    y = y * scale_ref[...] + shift_ref[...]           # single FMA epilogue, [OH*OW, OCp]
    yt = y.T                                          # [OCp, OH*OW] (XLU transpose)
    o_ref[0] = yt[:oc, :]                             # [OC, OH*OW]


def cb_forward(x, conv_w, conv_b, bn_gamma, bn_beta, stride, pad):
    """Conv2d(stride, pad) + BatchNorm2d (batch statistics). NCHW in / NCHW out.

    conv_b is accepted for API parity but intentionally unused: a per-channel constant
    bias cancels exactly under training-mode BatchNorm (y - mean).
    """
    del conv_b
    n, ic, h, w_img = x.shape
    oc, _, kh, kw = conv_w.shape
    oh = (h + 2 * pad - kh) // stride + 1
    ow = (w_img + 2 * pad - kw) // stride + 1
    hp, wp = h + 2 * pad, w_img + 2 * pad
    ocp = ((oc + 127) // 128) * 128                   # lane-dense channel padding

    # NCHW -> NHWC (channels on lanes) + zero spatial padding for the conv.
    xp = jnp.transpose(x.astype(jnp.float32), (0, 2, 3, 1))
    xp = jnp.pad(xp, ((0, 0), (pad, pad), (pad, pad), (0, 0)))

    # [OC, IC, KH, KW] -> [KH*KW, IC, OCp]  (OC zero-padded)
    wk = jnp.transpose(conv_w.astype(jnp.float32), (2, 3, 1, 0)).reshape(kh * kw, ic, oc)
    wk = jnp.pad(wk, ((0, 0), (0, 0), (0, ocp - oc)))

    cparams = pltpu.CompilerParams(
        dimension_semantics=("parallel",),
        vmem_limit_bytes=32 * 1024 * 1024,
    )

    # ---- Pass 1: per-image channel statistics ----
    stats = pl.pallas_call(
        functools.partial(conv_stats_kernel, oh=oh, ow=ow, kh=kh, kw=kw, stride=stride),
        out_shape=jax.ShapeDtypeStruct((n, 2, ocp), jnp.float32),
        grid=(n,),
        in_specs=[
            pl.BlockSpec((1, hp, wp, ic), lambda b: (b, 0, 0, 0)),
            pl.BlockSpec((kh * kw, ic, ocp), lambda b: (0, 0, 0)),
        ],
        out_specs=pl.BlockSpec((1, 2, ocp), lambda b: (b, 0, 0)),
        compiler_params=cparams,
    )(xp, wk)

    # ---- Tiny host-of-kernel math: combine stats, build fused scale/shift ----
    m_total = float(n * oh * ow)
    total = jnp.sum(stats, axis=0)                    # [2, OCp]
    mean = total[0] / m_total
    var = jnp.maximum(total[1] / m_total - mean * mean, 0.0)   # biased variance (BN train)
    gamma_p = jnp.pad(bn_gamma.astype(jnp.float32), (0, ocp - oc))
    beta_p = jnp.pad(bn_beta.astype(jnp.float32), (0, ocp - oc))
    scale = gamma_p * jax.lax.rsqrt(var + BN_EPS)
    shift = beta_p - mean * scale
    scale2 = scale.reshape(1, ocp)
    shift2 = shift.reshape(1, ocp)

    # ---- Pass 2: conv + BN affine, channel-major output (no XLA output transpose) ----
    out_flat = pl.pallas_call(
        functools.partial(conv_bn_kernel, oh=oh, ow=ow, kh=kh, kw=kw,
                          stride=stride, oc=oc),
        out_shape=jax.ShapeDtypeStruct((n, oc, oh * ow), jnp.float32),
        grid=(n,),
        in_specs=[
            pl.BlockSpec((1, hp, wp, ic), lambda b: (b, 0, 0, 0)),
            pl.BlockSpec((kh * kw, ic, ocp), lambda b: (0, 0, 0)),
            pl.BlockSpec((1, ocp), lambda b: (0, 0)),
            pl.BlockSpec((1, ocp), lambda b: (0, 0)),
        ],
        out_specs=pl.BlockSpec((1, oc, oh * ow), lambda b: (b, 0, 0)),
        compiler_params=cparams,
    )(xp, wk, scale2, shift2)

    return out_flat.reshape(n, oc, oh, ow)            # pure metadata reshape


def _reference(x, conv_w, conv_b, bn_gamma, bn_beta, stride, pad):
    """Pure-JAX reference: Conv2d (with bias) + training-mode BatchNorm2d."""
    y = jax.lax.conv_general_dilated(
        x, conv_w, window_strides=(stride, stride),
        padding=((pad, pad), (pad, pad)),
        dimension_numbers=("NCHW", "OIHW", "NCHW"))
    y = y + conv_b[None, :, None, None]
    mean = jnp.mean(y, axis=(0, 2, 3), keepdims=True)
    var = jnp.mean((y - mean) ** 2, axis=(0, 2, 3), keepdims=True)
    yhat = (y - mean) * jax.lax.rsqrt(var + BN_EPS)
    return yhat * bn_gamma[None, :, None, None] + bn_beta[None, :, None, None]


if __name__ == "__main__":
    # Shapes consistent with CB(in_channels=4, out_channels=8, k_size=3, stride=1, padding=1)
    N, IC, H, W = 2, 4, 16, 16
    OC, KH, KW = 8, 3, 3
    STRIDE, PAD = 1, 1

    key = jax.random.PRNGKey(0)
    kx, kw_, kb = jax.random.split(key, 3)

    x = jax.random.normal(kx, (N, IC, H, W), dtype=jnp.float32)
    conv_w = 0.1 * jax.random.normal(kw_, (OC, IC, KH, KW), dtype=jnp.float32)
    conv_b = 0.05 * jax.random.normal(kb, (OC,), dtype=jnp.float32)
    bn_gamma = jnp.ones((OC,), dtype=jnp.float32)     # nn.BatchNorm2d default init
    bn_beta = jnp.zeros((OC,), dtype=jnp.float32)

    out = cb_forward(x, conv_w, conv_b, bn_gamma, bn_beta, STRIDE, PAD)
    jax.block_until_ready(out)
    assert out.shape == (N, OC, H, W)

    ref = _reference(x, conv_w, conv_b, bn_gamma, bn_beta, STRIDE, PAD)
    jax.block_until_ready(ref)
    assert bool(jnp.allclose(out, ref, atol=3e-2, rtol=3e-2)), "mismatch vs reference"

    print("KERNEL_OK")
</pallas_src>

<mosaic_0001>
module attributes {stable_mosaic.version = 11 : i64} {
  func.func @conv_stats_kernel(%arg0: i32, %arg1: memref<1x18x18x4xf32, #tpu.memory_space<vmem>>, %arg2: memref<9x4x128xf32, #tpu.memory_space<vmem>>, %arg3: memref<1x2x128xf32, #tpu.memory_space<vmem>>) attributes {dimension_semantics = [#tpu.dimension_semantics<parallel>], iteration_bounds = array<i64: 2>, scalar_prefetch = 0 : i64, scratch_operands = 0 : i64, tpu.core_type = #tpu.core_type<tc>, window_params = [{transform_indices = @transform_0, window_bounds = array<i64: 1, 18, 18, 4>}, {pipeline_mode = #tpu.pipeline_mode<synchronous>, transform_indices = @transform_1, window_bounds = array<i64: 9, 4, 128>}, {transform_indices = @transform_2, window_bounds = array<i64: 1, 2, 128>}]} {
    %c0 = arith.constant 0 : index
    %c0_0 = arith.constant 0 : index
    %c0_1 = arith.constant 0 : index
    %c0_2 = arith.constant 0 : index
    %0 = vector.load %arg1[%c0, %c0_0, %c0_1, %c0_2] : memref<1x18x18x4xf32, #tpu.memory_space<vmem>>, vector<1x18x18x4xf32>
    %1 = vector.shape_cast %0 : vector<1x18x18x4xf32> to vector<18x18x4xf32>
    %cst = arith.constant 0.000000e+00 : f32
    %2 = vector.broadcast %cst : f32 to vector<256x128xf32>
    %3 = vector.extract_strided_slice %1 {offsets = [0, 0, 0], sizes = [16, 16, 4], strides = [1, 1, 1]} : vector<18x18x4xf32> to vector<16x16x4xf32>
    %4 = vector.shape_cast %3 : vector<16x16x4xf32> to vector<256x4xf32>
    %c0_3 = arith.constant 0 : index
    %c0_4 = arith.constant 0 : index
    %c0_5 = arith.constant 0 : index
    %5 = vector.load %arg2[%c0_3, %c0_4, %c0_5] : memref<9x4x128xf32, #tpu.memory_space<vmem>>, vector<1x4x128xf32>
    %6 = vector.shape_cast %5 : vector<1x4x128xf32> to vector<4x128xf32>
    %cst_6 = arith.constant dense<0.000000e+00> : vector<256x128xf32>
    %7 = tpu.matmul %4, %6, %cst_6 {dimension_numbers = #tpu.dot_dimension_numbers<[1], [0], [0], [1], [0, 0, 1, 1], [], []>} : vector<256x4xf32>, vector<4x128xf32>, vector<256x128xf32> -> vector<256x128xf32>
    %8 = arith.addf %2, %7 : vector<256x128xf32>
    %9 = vector.extract_strided_slice %1 {offsets = [0, 1, 0], sizes = [16, 16, 4], strides = [1, 1, 1]} : vector<18x18x4xf32> to vector<16x16x4xf32>
    %10 = vector.shape_cast %9 : vector<16x16x4xf32> to vector<256x4xf32>
    %c1 = arith.constant 1 : index
    %c0_7 = arith.constant 0 : index
    %c0_8 = arith.constant 0 : index
    %11 = vector.load %arg2[%c1, %c0_7, %c0_8] : memref<9x4x128xf32, #tpu.memory_space<vmem>>, vector<1x4x128xf32>
    %12 = vector.shape_cast %11 : vector<1x4x128xf32> to vector<4x128xf32>
    %cst_9 = arith.constant dense<0.000000e+00> : vector<256x128xf32>
    %13 = tpu.matmul %10, %12, %cst_9 {dimension_numbers = #tpu.dot_dimension_numbers<[1], [0], [0], [1], [0, 0, 1, 1], [], []>} : vector<256x4xf32>, vector<4x128xf32>, vector<256x128xf32> -> vector<256x128xf32>
    %14 = arith.addf %8, %13 : vector<256x128xf32>
    %15 = vector.extract_strided_slice %1 {offsets = [0, 2, 0], sizes = [16, 16, 4], strides = [1, 1, 1]} : vector<18x18x4xf32> to vector<16x16x4xf32>
    %16 = vector.shape_cast %15 : vector<16x16x4xf32> to vector<256x4xf32>
    %c2 = arith.constant 2 : index
    %c0_10 = arith.constant 0 : index
    %c0_11 = arith.constant 0 : index
    %17 = vector.load %arg2[%c2, %c0_10, %c0_11] : memref<9x4x128xf32, #tpu.memory_space<vmem>>, vector<1x4x128xf32>
    %18 = vector.shape_cast %17 : vector<1x4x128xf32> to vector<4x128xf32>
    %cst_12 = arith.constant dense<0.000000e+00> : vector<256x128xf32>
    %19 = tpu.matmul %16, %18, %cst_12 {dimension_numbers = #tpu.dot_dimension_numbers<[1], [0], [0], [1], [0, 0, 1, 1], [], []>} : vector<256x4xf32>, vector<4x128xf32>, vector<256x128xf32> -> vector<256x128xf32>
    %20 = arith.addf %14, %19 : vector<256x128xf32>
    %21 = vector.extract_strided_slice %1 {offsets = [1, 0, 0], sizes = [16, 16, 4], strides = [1, 1, 1]} : vector<18x18x4xf32> to vector<16x16x4xf32>
    %22 = vector.shape_cast %21 : vector<16x16x4xf32> to vector<256x4xf32>
    %c3 = arith.constant 3 : index
    %c0_13 = arith.constant 0 : index
    %c0_14 = arith.constant 0 : index
    %23 = vector.load %arg2[%c3, %c0_13, %c0_14] : memref<9x4x128xf32, #tpu.memory_space<vmem>>, vector<1x4x128xf32>
    %24 = vector.shape_cast %23 : vector<1x4x128xf32> to vector<4x128xf32>
    %cst_15 = arith.constant dense<0.000000e+00> : vector<256x128xf32>
    %25 = tpu.matmul %22, %24, %cst_15 {dimension_numbers = #tpu.dot_dimension_numbers<[1], [0], [0], [1], [0, 0, 1, 1], [], []>} : vector<256x4xf32>, vector<4x128xf32>, vector<256x128xf32> -> vector<256x128xf32>
    %26 = arith.addf %20, %25 : vector<256x128xf32>
    %27 = vector.extract_strided_slice %1 {offsets = [1, 1, 0], sizes = [16, 16, 4], strides = [1, 1, 1]} : vector<18x18x4xf32> to vector<16x16x4xf32>
    %28 = vector.shape_cast %27 : vector<16x16x4xf32> to vector<256x4xf32>
    %c4 = arith.constant 4 : index
    %c0_16 = arith.constant 0 : index
    %c0_17 = arith.constant 0 : index
    %29 = vector.load %arg2[%c4, %c0_16, %c0_17] : memref<9x4x128xf32, #tpu.memory_space<vmem>>, vector<1x4x128xf32>
    %30 = vector.shape_cast %29 : vector<1x4x128xf32> to vector<4x128xf32>
    %cst_18 = arith.constant dense<0.000000e+00> : vector<256x128xf32>
    %31 = tpu.matmul %28, %30, %cst_18 {dimension_numbers = #tpu.dot_dimension_numbers<[1], [0], [0], [1], [0, 0, 1, 1], [], []>} : vector<256x4xf32>, vector<4x128xf32>, vector<256x128xf32> -> vector<256x128xf32>
    %32 = arith.addf %26, %31 : vector<256x128xf32>
    %33 = vector.extract_strided_slice %1 {offsets = [1, 2, 0], sizes = [16, 16, 4], strides = [1, 1, 1]} : vector<18x18x4xf32> to vector<16x16x4xf32>
    %34 = vector.shape_cast %33 : vector<16x16x4xf32> to vector<256x4xf32>
    %c5 = arith.constant 5 : index
    %c0_19 = arith.constant 0 : index
    %c0_20 = arith.constant 0 : index
    %35 = vector.load %arg2[%c5, %c0_19, %c0_20] : memref<9x4x128xf32, #tpu.memory_space<vmem>>, vector<1x4x128xf32>
    %36 = vector.shape_cast %35 : vector<1x4x128xf32> to vector<4x128xf32>
    %cst_21 = arith.constant dense<0.000000e+00> : vector<256x128xf32>
    %37 = tpu.matmul %34, %36, %cst_21 {dimension_numbers = #tpu.dot_dimension_numbers<[1], [0], [0], [1], [0, 0, 1, 1], [], []>} : vector<256x4xf32>, vector<4x128xf32>, vector<256x128xf32> -> vector<256x128xf32>
    %38 = arith.addf %32, %37 : vector<256x128xf32>
    %39 = vector.extract_strided_slice %1 {offsets = [2, 0, 0], sizes = [16, 16, 4], strides = [1, 1, 1]} : vector<18x18x4xf32> to vector<16x16x4xf32>
    %40 = vector.shape_cast %39 : vector<16x16x4xf32> to vector<256x4xf32>
    %c6 = arith.constant 6 : index
    %c0_22 = arith.constant 0 : index
    %c0_23 = arith.constant 0 : index
    %41 = vector.load %arg2[%c6, %c0_22, %c0_23] : memref<9x4x128xf32, #tpu.memory_space<vmem>>, vector<1x4x128xf32>
    %42 = vector.shape_cast %41 : vector<1x4x128xf32> to vector<4x128xf32>
    %cst_24 = arith.constant dense<0.000000e+00> : vector<256x128xf32>
    %43 = tpu.matmul %40, %42, %cst_24 {dimension_numbers = #tpu.dot_dimension_numbers<[1], [0], [0], [1], [0, 0, 1, 1], [], []>} : vector<256x4xf32>, vector<4x128xf32>, vector<256x128xf32> -> vector<256x128xf32>
    %44 = arith.addf %38, %43 : vector<256x128xf32>
    %45 = vector.extract_strided_slice %1 {offsets = [2, 1, 0], sizes = [16, 16, 4], strides = [1, 1, 1]} : vector<18x18x4xf32> to vector<16x16x4xf32>
    %46 = vector.shape_cast %45 : vector<16x16x4xf32> to vector<256x4xf32>
    %c7 = arith.constant 7 : index
    %c0_25 = arith.constant 0 : index
    %c0_26 = arith.constant 0 : index
    %47 = vector.load %arg2[%c7, %c0_25, %c0_26] : memref<9x4x128xf32, #tpu.memory_space<vmem>>, vector<1x4x128xf32>
    %48 = vector.shape_cast %47 : vector<1x4x128xf32> to vector<4x128xf32>
    %cst_27 = arith.constant dense<0.000000e+00> : vector<256x128xf32>
    %49 = tpu.matmul %46, %48, %cst_27 {dimension_numbers = #tpu.dot_dimension_numbers<[1], [0], [0], [1], [0, 0, 1, 1], [], []>} : vector<256x4xf32>, vector<4x128xf32>, vector<256x128xf32> -> vector<256x128xf32>
    %50 = arith.addf %44, %49 : vector<256x128xf32>
    %51 = vector.extract_strided_slice %1 {offsets = [2, 2, 0], sizes = [16, 16, 4], strides = [1, 1, 1]} : vector<18x18x4xf32> to vector<16x16x4xf32>
    %52 = vector.shape_cast %51 : vector<16x16x4xf32> to vector<256x4xf32>
    %c8 = arith.constant 8 : index
    %c0_28 = arith.constant 0 : index
    %c0_29 = arith.constant 0 : index
    %53 = vector.load %arg2[%c8, %c0_28, %c0_29] : memref<9x4x128xf32, #tpu.memory_space<vmem>>, vector<1x4x128xf32>
    %54 = vector.shape_cast %53 : vector<1x4x128xf32> to vector<4x128xf32>
    %cst_30 = arith.constant dense<0.000000e+00> : vector<256x128xf32>
    %55 = tpu.matmul %52, %54, %cst_30 {dimension_numbers = #tpu.dot_dimension_numbers<[1], [0], [0], [1], [0, 0, 1, 1], [], []>} : vector<256x4xf32>, vector<4x128xf32>, vector<256x128xf32> -> vector<256x128xf32>
    %56 = arith.addf %50, %55 : vector<256x128xf32>
    %cst_31 = arith.constant dense<0.000000e+00> : vector<128xf32>
    %57 = vector.multi_reduction <add>, %56, %cst_31 [0] : vector<256x128xf32> to vector<128xf32>
    %58 = vector.shape_cast %57 : vector<128xf32> to vector<1x128xf32>
    %59 = arith.mulf %56, %56 : vector<256x128xf32>
    %cst_32 = arith.constant dense<0.000000e+00> : vector<128xf32>
    %60 = vector.multi_reduction <add>, %59, %cst_32 [0] : vector<256x128xf32> to vector<128xf32>
    %61 = vector.shape_cast %60 : vector<128xf32> to vector<1x128xf32>
    %62 = tpu.concatenate %58, %61 in 0 : vector<1x128xf32>, vector<1x128xf32> -> vector<2x128xf32>
    %c0_33 = arith.constant 0 : index
    %c0_34 = arith.constant 0 : index
    %c0_35 = arith.constant 0 : index
    %63 = vector.load %arg3[%c0_33, %c0_34, %c0_35] : memref<1x2x128xf32, #tpu.memory_space<vmem>>, vector<1x2x128xf32>
    %64 = vector.shape_cast %63 : vector<1x2x128xf32> to vector<2x128xf32>
    %65 = vector.shape_cast %62 : vector<2x128xf32> to vector<1x2x128xf32>
    tpu.vector_store %arg3[%c0_33, %c0_34, %c0_35], %65 {strides = array<i32>} : memref<1x2x128xf32, #tpu.memory_space<vmem>>, vector<1x2x128xf32>,
    return
  }
  func.func @transform_0(%arg0: i32) -> (i32, i32, i32, i32) {
    %c0_i32 = arith.constant 0 : i32
    %c0_i32_0 = arith.constant 0 : i32
    %c0_i32_1 = arith.constant 0 : i32
    %c0_i32_2 = arith.constant 0 : i32
    return %arg0, %c0_i32, %c0_i32_0, %c0_i32_1 : i32, i32, i32, i32
  }
  func.func @transform_1(%arg0: i32) -> (i32, i32, i32) {
    %c0_i32 = arith.constant 0 : i32
    %c0_i32_0 = arith.constant 0 : i32
    %c0_i32_1 = arith.constant 0 : i32
    %c0_i32_2 = arith.constant 0 : i32
    return %c0_i32, %c0_i32_0, %c0_i32_1 : i32, i32, i32
  }
  func.func @transform_2(%arg0: i32) -> (i32, i32, i32) {
    %c0_i32 = arith.constant 0 : i32
    %c0_i32_0 = arith.constant 0 : i32
    %c0_i32_1 = arith.constant 0 : i32
    return %arg0, %c0_i32, %c0_i32_0 : i32, i32, i32
  }
}

</mosaic_0001>

<bundles_post_ra>
// kernel: tpu_custom_call.1
= control target key start
LH: loop header
LB: loop body
LE: loop exit
PB: predicated region body
PF: predicated region fallthrough
CT: control target
= control target key end

     0   :  { %7 = vsyncpa [#allocation3], 0  ;;  %s5776_s0 = inlined_call_operand.vmem [shape: f32[2,18,18,4], index: 0, kind: input, shape index: {}]   ;;  %s5777_s1 = inlined_call_operand.vmem [shape: f32[9,4,128], index: 1, kind: input, shape index: {}]   ;;  %s5778_s2 = inlined_call_operand.hbm [shape: f32[2,2,128], index: 2, kind: output, shape index: {}]  }
   0x1   :  { %9 = vsyncpa [#allocation3 + $0x1], 0  ;;  %s4565_s9 = smov 0   ;;  %s4567_s10 = smov 0  }
   0x2   :  { %s4569_s11 = smov 0   ;;  %s4571_s12 = smov 0  }
   0x3 LB: > { %s4586_s13 = sadd.s32 4294967295, %s4547_s12   ;;  %s3125_s14 = sadd.s32 4294967294, %s4547_s12   ;;  %s4547_s12 = sphi %s4571_s12, %s5958_s12   ;;  %s4543_s11 = sphi %s4569_s11, %s5957_s11   ;;  %s4539_s10 = sphi %s4567_s10, %s5956_s10   ;;  %s4535_s9 = sphi %s4565_s9, %s5955_s9  }
   0x4   : > { %s4590_s15 = sadd.s32 1, %s4547_s12   ;;  %s69_s16 = sadd.s32 1, %s4543_s11 }
   0x5   : > { %s66_s17 = ssub.s32 %s4547_s12, %s4590_s15  ;;  %p79_p0 = scmp.ne.s32.totalorder %s4543_s11, %s4539_s10 }
   0x6   : > { %p67_p1 = scmp.eq.s32.totalorder %s66_s17, 0  ;;  %p80_p2 = scmp.eq.s32.totalorder %s4586_s13, 1 }
   0x7   : > { %p85_p3 = scmp.ne.s32.totalorder %s4539_s10, %s4535_s9  ;;  %p86_p4 = scmp.eq.s32.totalorder %s3125_s14, 1 }
   0x8   : > { %s4601_s18 = scalar_select %p67_p1, %s4543_s11, %s69_s16  }
   0x9   : > { %p4603_p5 = por %p80_p2, %p79_p0  ;;  %p4607_p6 = por %p86_p4, %p85_p3 }
   0xa   : > { %p3128_p7 = scmp.ge.s32.totalorder %s4547_s12, 1  ;;  %p115_p8 = scmp.lt.s32.totalorder %s4547_s12, 3 }
   0xc   : > { %p116_p9 = pnand %p3128_p7, %p115_p8 }
   0xe   : > { %119 = sbr.rel (%p116_p9) target bundleno = 566 (0x236), region = 28 }
  0x15   : > { %v3131_v0 = vld [vmem:[%s5777_s1 + $0x4] sm:$0xf]  ;;  %vm393_vm0 = vcmask 1043456   ;;  %v4619_v1 = vld [vmem:[%s5777_s1 + $0x10] sm:$0xf]  ;;  %p137_p10 = scmp.lt.s32.totalorder %s4586_s13, 1 }
  0x16   : > { %3737 = vmatprep.subr.msk.mxu1 %vm393_vm0, %v3131_v0  ;;  %3937 = vmatprep.subr.msk.mxu0 %vm393_vm0, %v4619_v1  ;;  %v196_v2 = vld [vmem:[%s5777_s1] sm:$0xf]  ;;  %v3300_v3 = vld [vmem:[%s5777_s1 + $0x14] sm:$0xf]  ;;  %vm245_vm1 = vcmask 1046528   ;;  %vm328_vm2 = vcmask 31744  }
  0x17   : > { %3738 = vmatpush3.msk.msra.mxu1 %vm393_vm0, %v3131_v0  ;;  %3938 = vmatpush3.msk.msra.mxu0 %vm393_vm0, %v4619_v1  ;;  %s138_s29 = scalar_select %p137_p10, %s4586_s13, 1  ;;  %v4705_v33 = vld [vmem:[%s5777_s1 + $0x18] sm:$0xf]  ;;  %v4715_v35 = vld [vmem:[%s5777_s1 + $0x8] sm:$0xf]  ;;  %vm914_vm3 = vcmask 1045504  }
  0x18   : > { %3787 = vmatprep.subr.msk.mxu1 %vm393_vm0, %v196_v2  ;;  %3987 = vmatprep.subr.msk.mxu0 %vm393_vm0, %v3300_v3  ;;  %s134_s25 = sand.u32 1, %s4539_s10   ;;  %s3437_s27 = sshll.u32 %s4586_s13, 5  ;;  %vm3049_vm4 = vcmask 1040384  }
  0x19   : > { %s4445_s30 = smul.u32 432, %s138_s29  ;;  %s3129_s26 = sshll.u32 %s134_s25, 1 }
  0x1a   : > { %s136_s28 = scalar_lea.vmem [#allocation2], %s3129_s26  ;;  %s5734_s4 = scalar_lea.hbm %s5778_s2, %s3437_s27 }
  0x1b   : > { %s4640_s5 = scalar_lea.vmem %s5776_s0, %s4445_s30  ;;  %s3066_s29 = sshll.u32 %s136_s28, 4  ;;  %s5736_s29 = int_to_ptr.vmem [resolvable:$true] %s3066_s29 }
  0x1c   : > { %v4643_v4 = vld [vmem:[%s4640_s5] sm:$0xff]  ;;  %v4646_v5 = vld [vmem:[%s4640_s5 + $0x8] sm:$0xff]  ;;  %v4649_v6 = vld [vmem:[%s4640_s5 + $0x18] sm:$0xff]  ;;  %s4485_s6 = scalar_lea.vmem %s5736_s29, 32  ;;  %s4549_s13 = smov [#allocation2]  }
  0x1d   : > { %5854 = vst [vmem:[#allocation5_spill] sm:$0xff] %v4649_v6  ;;  %v246_v7 = vrot.slane %v4643_v4, 1  ;;  %v247_v8 = vrot.slane %v4646_v5, 1  ;;  %v4654_v9 = vld [vmem:[%s4640_s5 + $0x20] sm:$0xff]  ;;  %v251_v10 = vrot.slane %v4649_v6, 1  ;;  %v4666_v15 = vld [vmem:[%s4640_s5 + $0x30] sm:$0xff]  ;;  %p4486_p11 = scmp.ne.s32.totalorder %s5736_s29, %s4485_s6 }
  0x1e   : > { %5855 = vst [vmem:[#allocation6_spill] sm:$0xff] %v4654_v9  ;;  %v4658_v11 = vld [vmem:[%s4640_s5 + $0x10] sm:$0x3]  ;;  %v252_v12 = vrot.slane %v4654_v9, 1  ;;  %v4663_v14 = vld [vmem:[%s4640_s5 + $0x28] sm:$0x3] }
  0x1f   : > { %v249_v13 = vrot.slane %v4658_v11, 1  ;;  %v248_v16 = vsel %vm245_vm1, %v246_v7, %v247_v8  ;;  %v254_v17 = vrot.slane %v4663_v14, 1  ;;  %v4671_v18 = vld [vmem:[%s4640_s5 + $0x38] sm:$0xff]  ;;  %v256_v19 = vrot.slane %v4666_v15, 1  ;;  %v4675_v20 = vld [vmem:[%s4640_s5 + $0x40] sm:$0x3]  ;;  %p4487_p12 = pnand %p4486_p11, %p4603_p5 }
  0x20   : > { %3739 = vmatprep.mubr.msk.f32.mxu1 %vm328_vm2, %v248_v16  ;;  %v253_v21 = vsel %vm245_vm1, %v251_v10, %v252_v12  ;;  %v257_v23 = vrot.slane %v4671_v18, 1  ;;  %v259_v24 = vrot.slane %v4675_v20, 1  ;;  %v4683_v25 = vld [vmem:[%s4640_s5 + $0x48] sm:$0xff]  ;;  %v4686_v26 = vld [vmem:[%s4640_s5 + $0x50] sm:$0xff]  ;;  %v4689_v27 = vld [vmem:[%s4640_s5 + $0x58] sm:$0x3] }
  0x21   : > { %v250_v22 = vsel %vm245_vm1, %v247_v8, %v249_v13  ;;  %3939 = vmatprep.mubr.msk.f32.mxu0 %vm328_vm2, %v253_v21  ;;  %v255_v28 = vsel %vm245_vm1, %v252_v12, %v254_v17  ;;  %v261_v29 = vrot.slane %v4683_v25, 1  ;;  %v262_v30 = vrot.slane %v4686_v26, 1  ;;  %v4697_v31 = vld [vmem:[%s4640_s5 + $0x60] sm:$0xff]  ;;  %v4700_v32 = vld [vmem:[%s4640_s5 + $0x68] sm:$0xff]  ;;  %v4731_v41 = vld [vmem:[%s4640_s5 + $0x70] sm:$0x3]  ;;  %p4488_p13 = pneg %p4487_p12 }
  0x22   : > { %3740 = vmatmul.mubr.msk.f32.vlgmr.msra.gmra.mrb[0].mxu1 %vm328_vm2, %v250_v22  ;;  %3940 = vmatmul.mubr.msk.f32.vlgmr.msra.gmra.mrb[0].mxu0 %vm328_vm2, %v255_v28  ;;  %v4710_v34 = vsel %vm245_vm1, %v256_v19, %v257_v23  ;;  %v4720_v36 = vsel %vm245_vm1, %v257_v23, %v259_v24  ;;  %v264_v37 = vrot.slane %v4689_v27, 1  ;;  %v266_v39 = vrot.slane %v4697_v31, 1  ;;  %v4737_v42 = vld [vmem:[%s4640_s5 + $0x78] sm:$0xff]  ;;  %v4740_v43 = vld [vmem:[%s4640_s5 + $0x80] sm:$0xff]  ;;  %v4760_v49 = vld [vmem:[%s4640_s5 + $0x88] sm:$0x3] }
  0x23   : > { %3788 = vmatpush3.msk.msra.mxu1 %vm393_vm0, %v196_v2  ;;  %5856 = vst [vmem:[#allocation7_spill] sm:$0xff] %v4710_v34  ;;  %3988 = vmatpush3.msk.msra.mxu0 %vm393_vm0, %v3300_v3  ;;  %5857 = vst [vmem:[#allocation8_spill] sm:$0xff] %v4720_v36  ;;  %v4726_v38 = vsel %vm245_vm1, %v261_v29, %v262_v30  ;;  %v267_v40 = vrot.slane %v4700_v32, 1  ;;  %v269_v45 = vrot.slane %v4731_v41, 1  ;;  %v271_v47 = vrot.slane %v4737_v42, 1  ;;  %v4765_v50 = vld [vmem:[%s4640_s5 + $0x90] sm:$0xff] }
  0x24   : > { %3742 = vmatprep.mubr.msk.f32.mxu1 %vm328_vm2, %v253_v21  ;;  %3942 = vmatprep.mubr.msk.f32.mxu0 %vm328_vm2, %v4710_v34  ;;  %5858 = vst [vmem:[#allocation9_spill] sm:$0xff] %v4726_v38  ;;  %v4751_v44 = vsel %vm245_vm1, %v262_v30, %v264_v37  ;;  %v272_v48 = vrot.slane %v4740_v43, 1  ;;  %v4768_v51 = vld [vmem:[%s4640_s5 + $0x98] sm:$0xff]  ;;  %v274_v53 = vrot.slane %v4760_v49, 1  ;;  %v276_v55 = vrot.slane %v4765_v50, 1  ;;  %v4791_v58 = vld [vmem:[%s4640_s5 + $0xa8] sm:$0xff] }
  0x25   : > { %4037 = vmatprep.subr.msk.mxu0 %vm393_vm0, %v4705_v33  ;;  %3837 = vmatprep.subr.msk.mxu1 %vm393_vm0, %v4715_v35  ;;  %5859 = vst [vmem:[#allocation10_spill] sm:$0xff] %v4751_v44  ;;  %v4755_v46 = vsel %vm245_vm1, %v266_v39, %v267_v40  ;;  %v4777_v52 = vsel %vm245_vm1, %v267_v40, %v269_v45  ;;  %v277_v56 = vrot.slane %v4768_v51, 1  ;;  %v4786_v57 = vld [vmem:[%s4640_s5 + $0xa0] sm:$0x3]  ;;  %v4794_v59 = vld [vmem:[%s4640_s5 + $0xb0] sm:$0xff]  ;;  %v281_v63 = vrot.slane %v4791_v58, 1 }
  0x26   : > { %3743 = vmatmul.mubr.msk.f32.gmra.mrb[2].mxu1 %vm328_vm2, %v255_v28  ;;  %3943 = vmatmul.mubr.msk.f32.gmra.mrb[2].mxu0 %vm328_vm2, %v4720_v36  ;;  %5860 = vst [vmem:[#allocation11_spill] sm:$0xff] %v4755_v46  ;;  %5861 = vst [vmem:[#allocation12_spill] sm:$0xff] %v4777_v52  ;;  %v4781_v54 = vsel %vm245_vm1, %v271_v47, %v272_v48  ;;  %v4803_v60 = vsel %vm245_vm1, %v272_v48, %v274_v53  ;;  %v279_v61 = vrot.slane %v4786_v57, 1  ;;  %v4812_v2 = vld [vmem:[%s4640_s5 + $0xb8] sm:$0x3]  ;;  %v4817_v3 = vld [vmem:[%s4640_s5 + $0xc0] sm:$0xff] }
  0x27   : > { %3745 = vmatprep.mubr.msk.f32.mxu1 %vm328_vm2, %v4710_v34  ;;  %3945 = vmatprep.mubr.msk.f32.mxu0 %vm328_vm2, %v4726_v38  ;;  %5862 = vst [vmem:[#allocation13_spill] sm:$0xff] %v4781_v54  ;;  %5863 = vst [vmem:[#allocation14_spill] sm:$0xff] %v4803_v60  ;;  %v4807_v62 = vsel %vm245_vm1, %v276_v55, %v277_v56  ;;  %v282_v0 = vrot.slane %v4794_v59, 1  ;;  %v4820_v7 = vld [vmem:[%s4640_s5 + $0xc8] sm:$0xff]  ;;  %v284_v10 = vrot.slane %v4812_v2, 1  ;;  %v286_v13 = vrot.slane %v4817_v3, 1 }
  0x28   : > { %5864 = vst [vmem:[#allocation15_spill] sm:$0xff] %v4807_v62  ;;  %v4829_v8 = vsel %vm245_vm1, %v277_v56, %v279_v61  ;;  %v287_v16 = vrot.slane %v4820_v7, 1  ;;  %v4838_v17 = vld [vmem:[%s4640_s5 + $0xd0] sm:$0x3]  ;;  %v920_v23 = vrot.slane %v4649_v6, 2  ;;  %v921_v24 = vrot.slane %v4654_v9, 2 }
  0x29   : > { %5865 = vst [vmem:[#allocation16_spill] sm:$0xff] %v4829_v8  ;;  %v4833_v12 = vsel %vm245_vm1, %v281_v63, %v282_v0  ;;  %v4849_v19 = vsel %vm245_vm1, %v282_v0, %v284_v10  ;;  %v289_v21 = vrot.slane %v4838_v17, 1  ;;  %v4858_v28 = vld [vmem:[%s4640_s5 + $0xd8] sm:$0xff]  ;;  %v4861_v29 = vld [vmem:[%s4640_s5 + $0xe0] sm:$0xff]  ;;  %v923_v30 = vrot.slane %v4663_v14, 2  ;;  %v4886_v53 = vld [vmem:[%s4640_s5 + $0xf0] sm:$0xff] }
  0x2a   : > { %3746 = vmatmul.mubr.msk.f32.gmra.mrb[4].mxu1 %vm328_vm2, %v4720_v36  ;;  %3946 = vmatmul.mubr.msk.f32.gmra.mrb[4].mxu0 %vm328_vm2, %v4751_v44  ;;  %5866 = vst [vmem:[#allocation17_spill] sm:$0xff] %v4833_v12  ;;  %5867 = vst [vmem:[#allocation18_spill] sm:$0xff] %v4849_v19  ;;  %v4853_v22 = vsel %vm245_vm1, %v286_v13, %v287_v16  ;;  %v291_v39 = vrot.slane %v4858_v28, 1  ;;  %v292_v40 = vrot.slane %v4861_v29, 1  ;;  %v4878_v45 = vld [vmem:[%s4640_s5 + $0xe8] sm:$0x3] }
  0x2b   : > { %3748 = vmatprep.mubr.msk.f32.mxu1 %vm328_vm2, %v4726_v38  ;;  %3948 = vmatprep.mubr.msk.f32.mxu0 %vm328_vm2, %v4755_v46  ;;  %5868 = vst [vmem:[#allocation19_spill] sm:$0xff] %v4853_v22  ;;  %v4873_v37 = vsel %vm245_vm1, %v287_v16, %v289_v21  ;;  %v4881_v47 = vsel %vm914_vm3, %v920_v23, %v921_v24  ;;  %v925_v48 = vrot.slane %v4666_v15, 2  ;;  %v926_v14 = vrot.slane %v4671_v18, 2  ;;  %v4889_v55 = vld [vmem:[%s4640_s5 + $0xf8] sm:$0xff]  ;;  %v4910_v16 = vld [vmem:[%s4640_s5 + $0x100] sm:$0x3] }
  0x2c   : > { %5869 = vst [vmem:[#allocation20_spill] sm:$0xff] %v4873_v37  ;;  %v294_v56 = vrot.slane %v4878_v45, 1  ;;  %v928_v61 = vrot.slane %v4675_v20, 2  ;;  %v4902_v63 = vsel %vm914_vm3, %v921_v24, %v923_v30  ;;  %v4905_v0 = vsel %vm245_vm1, %v291_v39, %v292_v40  ;;  %v4921_v24 = vld [vmem:[%s4640_s5 + $0x110] sm:$0xff]  ;;  %v4928_v30 = vld [vmem:[%s5777_s1 + $0x1c] sm:$0xf] }
  0x2d   : > { %5870 = vst [vmem:[#allocation21_spill] sm:$0xff] %v4905_v0  ;;  %v296_v10 = vrot.slane %v4886_v53, 1  ;;  %v297_v13 = vrot.slane %v4889_v55, 1  ;;  %v4913_v21 = vsel %vm914_vm3, %v925_v48, %v926_v14  ;;  %v930_v20 = vrot.slane %v4683_v25, 2  ;;  %v5024_v36 = vld [vmem:[%s4640_s5 + $0x148] sm:$0x3] }
  0x2e   : > { %3749 = vmatmul.mubr.msk.f32.gmra.mrb[6].mxu1 %vm328_vm2, %v4751_v44  ;;  %3949 = vmatmul.mubr.msk.f32.gmra.mrb[6].mxu0 %vm328_vm2, %v4777_v52  ;;  %v931_v23 = vrot.slane %v4686_v26, 2  ;;  %v4935_v39 = vsel %vm245_vm1, %v292_v40, %v294_v56  ;;  %v4938_v48 = vsel %vm914_vm3, %v926_v14, %v928_v61  ;;  %v302_v40 = vrot.slane %v4921_v24, 1  ;;  %v4952_v56 = vld [vmem:[%s4640_s5 + $0x118] sm:$0x3]  ;;  %s4489_s7 = sshll.u32 %s4549_s13, 4  ;;  %s4490_s7 = int_to_ptr.vmem [resolvable:$false] %s4489_s7 }
  0x2f   : > { %3751 = vmatprep.mubr.msk.f32.mxu1 %vm328_vm2, %v4755_v46  ;;  %3951 = vmatprep.mubr.msk.f32.mxu0 %vm328_vm2, %v4781_v54  ;;  %5871 = vst [vmem:[#allocation22_spill] sm:$0xff] %v4935_v39  ;;  %5872 = vst [vmem:[#allocation23_spill] sm:$0xff] %v4938_v48  ;;  %v935_v61 = vrot.slane %v4697_v31, 2  ;;  %v4997_v46 = vld [vmem:[%s4640_s5 + $0x138] sm:$0xff]  ;;  %v943_v44 = vrot.slane %v4760_v49, 2  ;;  %v948_v34 = vrot.slane %v4786_v57, 2  ;;  %p4492_p0 = scmp.lt.s32.totalorder %s5736_s29, %s4490_s7 }
  0x30   : > { %v4955_v14 = vsel %vm914_vm3, %v930_v20, %v931_v23  ;;  %v304_v20 = vrot.slane %v4952_v56, 1  ;;  %v311_v38 = vrot.slane %v4997_v46, 1  ;;  %v950_v57 = vrot.slane %v4791_v58, 2  ;;  %s4491_s8 = scalar_lea.vmem %s4490_s7, 64 }
  0x31   : > { %5874 = vst [vmem:[#allocation25_spill] sm:$0xff] %v4955_v14  ;;  %p4493_p1 = scmp.lt.s32.totalorder %s4491_s8, %s4485_s6 }
  0x32   : > { %3752 = vmatmul.mubr.msk.f32.gmra.mrb[8].mxu1 %vm328_vm2, %v4777_v52  ;;  %3952 = vmatmul.mubr.msk.f32.gmra.mrb[8].mxu0 %vm328_vm2, %v4803_v60  ;;  %v4989_v52 = vld [vmem:[%s4640_s5 + $0x130] sm:$0x3] }
  0x33   : > { %3754 = vmatprep.mubr.msk.f32.mxu1 %vm328_vm2, %v4781_v54  ;;  %3954 = vmatprep.mubr.msk.f32.mxu0 %vm328_vm2, %v4807_v62  ;;  %p4494_p2 = por %p4493_p1, %p4492_p0 }
  0x35   : > { %p4495_p3 = pnand %p4494_p2, %p4488_p13 }
  0x36   : > { %3755 = vmatmul.mubr.msk.f32.gmra.mrb[10].mxu1 %vm328_vm2, %v4803_v60  ;;  %3955 = vmatmul.mubr.msk.f32.gmra.mrb[10].mxu0 %vm328_vm2, %v4829_v8 }
  0x37   : > { %3757 = vmatprep.mubr.msk.f32.mxu1 %vm328_vm2, %v4807_v62  ;;  %3957 = vmatprep.mubr.msk.f32.mxu0 %vm328_vm2, %v4833_v12  ;;  %v938_v62 = vrot.slane %v4731_v41, 2  ;;  %v940_v41 = vrot.slane %v4737_v42, 2 }
  0x3a   : > { %3758 = vmatmul.mubr.msk.f32.gmra.mrb[12].mxu1 %vm328_vm2, %v4829_v8  ;;  %3958 = vmatmul.mubr.msk.f32.gmra.mrb[12].mxu0 %vm328_vm2, %v4849_v19  ;;  %v4960_v8 = vld [vmem:[%s4640_s5 + $0x120] sm:$0xff] }
  0x3b   : > { %3760 = vmatprep.mubr.msk.f32.mxu1 %vm328_vm2, %v4833_v12  ;;  %3960 = vmatprep.mubr.msk.f32.mxu0 %vm328_vm2, %v4853_v22  ;;  %v933_v12 = vrot.slane %v4689_v27, 2  ;;  %v306_v54 = vrot.slane %v4960_v8, 1 }
  0x3d   : > { %v4981_v60 = vsel %vm914_vm3, %v931_v23, %v933_v12  ;;  %v5000_v12 = vld [vmem:[%s4640_s5 + $0x140] sm:$0xff] }
  0x3e   : > { %3761 = vmatmul.mubr.msk.f32.gmra.mrb[14].mxu1 %vm328_vm2, %v4849_v19  ;;  %3961 = vmatmul.mubr.msk.f32.gmra.mrb[14].mxu0 %vm328_vm2, %v4873_v37  ;;  %v4946_v19 = vsel %vm245_vm1, %v296_v10, %v297_v13  ;;  %v4963_v10 = vld [vmem:[%s4640_s5 + $0x128] sm:$0xff]  ;;  %5876 = vst [vmem:[#allocation27_spill] sm:$0xff] %v4981_v60 }
  0x3f   : > { %3763 = vmatprep.mubr.msk.f32.mxu1 %vm328_vm2, %v4853_v22  ;;  %3989 = vmatprep.mubr.msk.f32.mxu0 %vm328_vm2, %v4881_v47  ;;  %v4918_v22 = vld [vmem:[%s4640_s5 + $0x108] sm:$0xff]  ;;  %5873 = vst [vmem:[#allocation24_spill] sm:$0xff] %v4946_v19 }
  0x42   : > { %3764 = vmatmul.mubr.msk.f32.gmra.mrb[16].mxu1 %vm328_vm2, %v4873_v37  ;;  %3990 = vmatmul.mubr.msk.f32.vlgmr.msra.gmra.mrb[0].mxu0 %vm328_vm2, %v4902_v63  ;;  %v299_v37 = vrot.slane %v4910_v16, 1 }
  0x43   : > { %3766 = vmatprep.mubr.msk.f32.mxu1 %vm328_vm2, %v4905_v0  ;;  %4038 = vmatpush3.msk.msra.mxu0 %vm393_vm0, %v4705_v33  ;;  %v301_v0 = vrot.slane %v4918_v22, 1  ;;  %v936_v33 = vrot.slane %v4700_v32, 2 }
  0x44   : > { %3992 = vmatprep.mubr.msk.f32.mxu0 %vm328_vm2, %v4913_v21  ;;  %4087 = vmatprep.subr.msk.mxu0 %vm393_vm0, %v4928_v30  ;;  %v4974_v27 = vsel %vm245_vm1, %v297_v13, %v299_v37  ;;  %v941_v13 = vrot.slane %v4740_v43, 2 }
  0x45   : > { %5875 = vst [vmem:[#allocation26_spill] sm:$0xff] %v4974_v27  ;;  %v4992_v37 = vsel %vm914_vm3, %v935_v61, %v936_v33  ;;  %v5012_v23 = vsel %vm914_vm3, %v936_v33, %v938_v62  ;;  %v309_v61 = vrot.slane %v4989_v52, 1  ;;  %v945_v62 = vrot.slane %v4765_v50, 2 }
  0x46   : > { %3767 = vmatmul.mubr.msk.f32.gmra.mrb[18].mxu1 %vm328_vm2, %v4935_v39  ;;  %3993 = vmatmul.mubr.msk.f32.gmra.mrb[2].mxu0 %vm328_vm2, %v4938_v48  ;;  %v4984_v39 = vsel %vm245_vm1, %v301_v0, %v302_v40  ;;  %5878 = vst [vmem:[#allocation29_spill] sm:$0xff] %v4992_v37  ;;  %v5009_v0 = vsel %vm245_vm1, %v302_v40, %v304_v20  ;;  %5880 = vst [vmem:[#allocation31_spill] sm:$0xff] %v5012_v23  ;;  %v946_v33 = vrot.slane %v4768_v51, 2  ;;  %v5032_v20 = vld [vmem:[%s4640_s5 + $0x150] sm:$0xff]  ;;  %v5094_v48 = vld [vmem:[%s4640_s5 + $0x178] sm:$0x3] }
  0x47   : > { %3769 = vmatprep.mubr.msk.f32.mxu1 %vm328_vm2, %v4946_v19  ;;  %3995 = vmatprep.mubr.msk.f32.mxu0 %vm328_vm2, %v4955_v14  ;;  %5877 = vst [vmem:[#allocation28_spill] sm:$0xff] %v4984_v39  ;;  %v307_v19 = vrot.slane %v4963_v10, 1  ;;  %5879 = vst [vmem:[#allocation30_spill] sm:$0xff] %v5009_v0  ;;  %v5027_v40 = vsel %vm914_vm3, %v940_v41, %v941_v13  ;;  %v314_v41 = vrot.slane %v5024_v36, 1 }
  0x48   : > { %5882 = vst [vmem:[#allocation33_spill] sm:$0xff] %v5027_v40 }
  0x49   : > { %v5044_v49 = vsel %vm245_vm1, %v307_v19, %v309_v61  ;;  %v951_v61 = vrot.slane %v4794_v59, 2 }
  0x4a   : > { %3770 = vmatmul.mubr.msk.f32.gmra.mrb[20].mxu1 %vm328_vm2, %v4974_v27  ;;  %3996 = vmatmul.mubr.msk.f32.gmra.mrb[4].mxu0 %vm328_vm2, %v4981_v60  ;;  %v5018_v27 = vsel %vm245_vm1, %v306_v54, %v307_v19  ;;  %v5035_v54 = vld [vmem:[%s4640_s5 + $0x158] sm:$0xff]  ;;  %5883 = vst [vmem:[#allocation34_spill] sm:$0xff] %v5044_v49  ;;  %v5059_v60 = vld [vmem:[%s4640_s5 + $0x160] sm:$0x3]  ;;  %v5062_v19 = vsel %vm914_vm3, %v945_v62, %v946_v33 }
  0x4b   : > { %3772 = vmatprep.mubr.msk.f32.mxu1 %vm328_vm2, %v4984_v39  ;;  %3998 = vmatprep.mubr.msk.f32.mxu0 %vm328_vm2, %v4992_v37  ;;  %5881 = vst [vmem:[#allocation32_spill] sm:$0xff] %v5018_v27  ;;  %v312_v39 = vrot.slane %v5000_v12, 1  ;;  %v5051_v37 = vsel %vm914_vm3, %v941_v13, %v943_v44  ;;  %v5070_v44 = vld [vmem:[%s4640_s5 + $0x170] sm:$0xff]  ;;  %v5082_v13 = vsel %vm914_vm3, %v946_v33, %v948_v34  ;;  %v319_v62 = vrot.slane %v5059_v60, 1 }
  0x4c   : > { %5884 = vst [vmem:[#allocation35_spill] sm:$0xff] %v5051_v37  ;;  %5886 = vst [vmem:[#allocation37_spill] sm:$0xff] %v5070_v44  ;;  %v955_v34 = vrot.slane %v4817_v3, 2  ;;  %v956_v33 = vrot.slane %v4820_v7, 2 }
  0x4d   : > { %5888 = vst [vmem:[#allocation39_spill] sm:$0xff] %v5082_v13 }
  0x4e   : > { %3773 = vmatmul.mubr.msk.f32.gmra.mrb[22].mxu1 %vm328_vm2, %v5009_v0  ;;  %3999 = vmatmul.mubr.msk.f32.gmra.mrb[6].mxu0 %vm328_vm2, %v5012_v23  ;;  %v5054_v0 = vsel %vm245_vm1, %v311_v38, %v312_v39  ;;  %v316_v23 = vrot.slane %v5032_v20, 1  ;;  %v5079_v38 = vsel %vm245_vm1, %v312_v39, %v314_v41  ;;  %v5097_v39 = vsel %vm914_vm3, %v950_v57, %v951_v61 }
  0x4f   : > { %3775 = vmatprep.mubr.msk.f32.mxu1 %vm328_vm2, %v5018_v27  ;;  %4001 = vmatprep.mubr.msk.f32.mxu0 %vm328_vm2, %v5027_v40  ;;  %5885 = vst [vmem:[#allocation36_spill] sm:$0xff] %v5054_v0  ;;  %v317_v27 = vrot.slane %v5035_v54, 1  ;;  %v5067_v40 = vld [vmem:[%s4640_s5 + $0x168] sm:$0xff]  ;;  %5887 = vst [vmem:[#allocation38_spill] sm:$0xff] %v5079_v38 }
  0x51   : > { %v5088_v14 = vsel %vm245_vm1, %v316_v23, %v317_v27  ;;  %v324_v23 = vrot.slane %v5094_v48, 1 }
  0x52   : > { %3776 = vmatmul.mubr.msk.f32.gmra.mrb[24].mxu1 %vm328_vm2, %v5044_v49  ;;  %4002 = vmatmul.mubr.msk.f32.gmra.mrb[8].mxu0 %vm328_vm2, %v5051_v37  ;;  %5889 = vst [vmem:[#allocation40_spill] sm:$0xff] %v5088_v14  ;;  %v953_v49 = vrot.slane %v4812_v2, 2  ;;  %v321_v37 = vrot.slane %v5067_v40, 1  ;;  %v5108_v2 = vsel %vm245_vm1, %v317_v27, %v319_v62  ;;  %v961_v27 = vrot.slane %v4861_v29, 2 }
  0x53   : > { %3778 = vmatprep.mubr.msk.f32.mxu1 %vm328_vm2, %v5054_v0  ;;  %4004 = vmatprep.mubr.msk.f32.mxu0 %vm328_vm2, %v5062_v19  ;;  %v322_v0 = vrot.slane %v5070_v44, 1  ;;  %5890 = vst [vmem:[#allocation41_spill] sm:$0xff] %v5108_v2  ;;  %v965_v62 = vrot.slane %v4886_v53, 2 }
  0x54   : > { %v5114_v41 = vsel %vm914_vm3, %v951_v61, %v953_v49  ;;  %v963_v49 = vrot.slane %v4878_v45, 2 }
  0x55   : > { %v5117_v57 = vsel %vm245_vm1, %v321_v37, %v322_v0  ;;  %v5132_v37 = vsel %vm245_vm1, %v322_v0, %v324_v23  ;;  %v5167_v23 = vld [vmem:[%s5777_s1 + $0xc] sm:$0xf] }
  0x56   : > { %3779 = vmatmul.mubr.msk.f32.gmra.mrb[26].mxu1 %vm328_vm2, %v5079_v38  ;;  %4005 = vmatmul.mubr.msk.f32.gmra.mrb[10].mxu0 %vm328_vm2, %v5082_v13  ;;  %5891 = vst [vmem:[#allocation42_spill] sm:$0xff] %v5117_v57  ;;  %v958_v38 = vrot.slane %v4838_v17, 2  ;;  %v5121_v13 = vsel %vm914_vm3, %v955_v34, %v956_v33  ;;  %5892 = vst [vmem:[#allocation43_spill] sm:$0xff] %v5132_v37  ;;  %v966_v34 = vrot.slane %v4889_v55, 2 }
  0x57   : > { %3781 = vmatprep.mubr.msk.f32.mxu1 %vm328_vm2, %v5088_v14  ;;  %4007 = vmatprep.mubr.msk.f32.mxu0 %vm328_vm2, %v5097_v39  ;;  %v960_v14 = vrot.slane %v4858_v28, 2  ;;  %v5154_v45 = vsel %vm914_vm3, %v961_v27, %v963_v49 }
  0x58   : > { %v5137_v17 = vsel %vm914_vm3, %v956_v33, %v958_v38  ;;  %v5158_v0 = vsel %vm914_vm3, %v965_v62, %v966_v34  ;;  %v970_v38 = vrot.slane %v4918_v22, 2  ;;  %v971_v33 = vrot.slane %v4921_v24, 2 }
  0x59   : > { %v5141_v61 = vsel %vm914_vm3, %v960_v14, %v961_v27  ;;  %v968_v14 = vrot.slane %v4910_v16, 2  ;;  %v973_v27 = vrot.slane %v4952_v56, 2  ;;  %v975_v62 = vrot.slane %v4960_v8, 2 }
  0x5a   : > { %3782 = vmatmul.mubr.msk.f32.gmra.mrb[28].mxu1 %vm328_vm2, %v5108_v2  ;;  %4008 = vmatmul.mubr.msk.f32.gmra.mrb[12].mxu0 %vm328_vm2, %v5114_v41  ;;  %v5182_v49 = vsel %vm914_vm3, %v970_v38, %v971_v33  ;;  %v980_v38 = vrot.slane %v4997_v46, 2  ;;  %v991_v2 = vrot.slane %v5070_v44, 2 }
  0x5b   : > { %3784 = vmatprep.mubr.msk.f32.mxu1 %vm328_vm2, %v5117_v57  ;;  %4010 = vmatprep.mubr.msk.f32.mxu0 %vm328_vm2, %v5121_v13  ;;  %v5178_v16 = vsel %vm914_vm3, %v966_v34, %v968_v14  ;;  %5893 = vst [vmem:[#allocation44_spill] sm:$0xff] %v5182_v49  ;;  %v5197_v56 = vsel %vm914_vm3, %v971_v33, %v973_v27  ;;  %v978_v34 = vrot.slane %v4989_v52, 2  ;;  %v983_v33 = vrot.slane %v5024_v36, 2 }
  0x5c   : > { %v986_v57 = vrot.slane %v5035_v54, 2 }
  0x5e   : > { %3785 = vmatmul.mubr.msk.f32.gmra.mrb[30].mxu1 %vm328_vm2, %v5132_v37  ;;  %4011 = vmatmul.mubr.msk.f32.gmra.mrb[14].mxu0 %vm328_vm2, %v5137_v17  ;;  %v981_v37 = vrot.slane %v5000_v12, 2 }
  0x5f   : > { %3789 = vmatprep.mubr.msk.f32.mxu1 %vm328_vm2, %v4643_v4  ;;  %4013 = vmatprep.mubr.msk.f32.mxu0 %vm328_vm2, %v5141_v61 }
  0x60   : > { %v5218_v27 = vsel %vm914_vm3, %v980_v38, %v981_v37  ;;  %v5231_v36 = vsel %vm914_vm3, %v981_v37, %v983_v33  ;;  %v990_v38 = vrot.slane %v5067_v40, 2  ;;  %v993_v37 = vrot.slane %v5094_v48, 2 }
  0x61   : > { %5895 = vst [vmem:[#allocation46_spill] sm:$0xff] %v5218_v27  ;;  %5896 = vst [vmem:[#allocation47_spill] sm:$0xff] %v5231_v36 }
  0x62   : > { %3790 = vmatmul.mubr.msk.f32.vlgmr.msra.gmra.mrb[0].mxu1 %vm328_vm2, %v4646_v5  ;;  %4014 = vmatmul.mubr.msk.f32.gmra.mrb[16].mxu0 %vm328_vm2, %v5154_v45  ;;  %v5258_v33 = vsel %vm914_vm3, %v990_v38, %v991_v2  ;;  %v5274_v48 = vsel %vm914_vm3, %v991_v2, %v993_v37  ;;  %v916_v38 = vrot.slane %v4646_v5, 2  ;;  %v918_v37 = vrot.slane %v4658_v11, 2  ;;  %v5903_v5 = vld [vmem:[#allocation23_spill] sm:$0xff]  ;;  %v5904_v11 = vld [vmem:[#allocation25_spill] sm:$0xff] }
  0x63   : > { %3838 = vmatpush3.msk.msra.mxu1 %vm393_vm0, %v4715_v35  ;;  %3792 = vmatprep.mubr.msk.f32.mxu1 %vm328_vm2, %v4649_v6  ;;  %v976_v35 = vrot.slane %v4963_v10, 2  ;;  %v5245_v6 = vld [vmem:[%s4640_s5 + $0x188] sm:$0xff]  ;;  %5899 = vst [vmem:[#allocation50_spill] sm:$0xff] %v5258_v33  ;;  %5900 = vst [vmem:[#allocation51_spill] sm:$0xff] %v5274_v48 }
  0x64   : > { %4016 = vmatprep.mubr.msk.f32.mxu0 %vm328_vm2, %v5158_v0  ;;  %3887 = vmatprep.subr.msk.mxu1 %vm393_vm0, %v5167_v23 }
  0x65   : > { %v5201_v14 = vsel %vm914_vm3, %v975_v62, %v976_v35  ;;  %v5214_v52 = vsel %vm914_vm3, %v976_v35, %v978_v34  ;;  %v985_v62 = vrot.slane %v5032_v20, 2  ;;  %v988_v35 = vrot.slane %v5059_v60, 2 }
  0x66   : > { %3793 = vmatmul.mubr.msk.f32.gmra.mrb[2].mxu1 %vm328_vm2, %v4654_v9  ;;  %4017 = vmatmul.mubr.msk.f32.gmra.mrb[18].mxu0 %vm328_vm2, %v5178_v16  ;;  %5894 = vst [vmem:[#allocation45_spill] sm:$0xff] %v5214_v52  ;;  %v5242_v9 = vld [vmem:[%s4640_s5 + $0x180] sm:$0xff] }
  0x67   : > { %3795 = vmatprep.mubr.msk.f32.mxu1 %vm328_vm2, %v4666_v15  ;;  %4019 = vmatprep.mubr.msk.f32.mxu0 %vm328_vm2, %v5182_v49  ;;  %v5235_v34 = vsel %vm914_vm3, %v985_v62, %v986_v57  ;;  %v5254_v60 = vsel %vm914_vm3, %v986_v57, %v988_v35  ;;  %v1861_v62 = vrot.slane %v5242_v9, 2 }
  0x68   : > { %5897 = vst [vmem:[#allocation48_spill] sm:$0xff] %v5235_v34  ;;  %5898 = vst [vmem:[#allocation49_spill] sm:$0xff] %v5254_v60 }
  0x6a   : > { %3796 = vmatmul.mubr.msk.f32.gmra.mrb[4].mxu1 %vm328_vm2, %v4671_v18  ;;  %4020 = vmatmul.mubr.msk.f32.gmra.mrb[20].mxu0 %vm328_vm2, %v5197_v56 }
  0x6b   : > { %3798 = vmatprep.mubr.msk.f32.mxu1 %vm328_vm2, %v4683_v25  ;;  %4022 = vmatprep.mubr.msk.f32.mxu0 %vm328_vm2, %v5201_v14 }
  0x6e   : > { %3799 = vmatmul.mubr.msk.f32.gmra.mrb[6].mxu1 %vm328_vm2, %v4686_v26  ;;  %4023 = vmatmul.mubr.msk.f32.gmra.mrb[22].mxu0 %vm328_vm2, %v5214_v52  ;;  %v5263_v52 = vld [vmem:[%s4640_s5 + $0x190] sm:$0x3] }
  0x6f   : > { %3801 = vmatprep.mubr.msk.f32.mxu1 %vm328_vm2, %v4697_v31  ;;  %4025 = vmatprep.mubr.msk.f32.mxu0 %vm328_vm2, %v5218_v27  ;;  %v1862_v27 = vrot.slane %v5245_v6, 2  ;;  %v1864_v57 = vrot.slane %v5263_v52, 2 }
  0x71   : > { %v5278_v35 = vsel %vm914_vm3, %v1861_v62, %v1862_v27  ;;  %v5289_v2 = vsel %vm914_vm3, %v1862_v27, %v1864_v57  ;;  %v5304_v27 = vld [vmem:[%s5777_s1 + $0x20] sm:$0xf]  ;;  %v5908_v57 = vld [vmem:[#allocation33_spill] sm:$0xff] }
  0x72   : > { %3802 = vmatmul.mubr.msk.f32.gmra.mrb[8].mxu1 %vm328_vm2, %v4700_v32  ;;  %4026 = vmatmul.mubr.msk.f32.gmra.mrb[24].mxu0 %vm328_vm2, %v5231_v36  ;;  %5901 = vst [vmem:[#allocation52_spill] sm:$0xff] %v5278_v35  ;;  %5902 = vst [vmem:[#allocation53_spill] sm:$0xff] %v5289_v2 }
  0x73   : > { %3804 = vmatprep.mubr.msk.f32.mxu1 %vm328_vm2, %v4737_v42  ;;  %4028 = vmatprep.mubr.msk.f32.mxu0 %vm328_vm2, %v5235_v34 }
  0x76   : > { %3805 = vmatmul.mubr.msk.f32.gmra.mrb[10].mxu1 %vm328_vm2, %v4740_v43  ;;  %4029 = vmatmul.mubr.msk.f32.gmra.mrb[26].mxu0 %vm328_vm2, %v5254_v60 }
  0x77   : > { %3807 = vmatprep.mubr.msk.f32.mxu1 %vm328_vm2, %v4765_v50  ;;  %4031 = vmatprep.mubr.msk.f32.mxu0 %vm328_vm2, %v5258_v33 }
  0x7a   : > { %3808 = vmatmul.mubr.msk.f32.gmra.mrb[12].mxu1 %vm328_vm2, %v4768_v51  ;;  %4032 = vmatmul.mubr.msk.f32.gmra.mrb[28].mxu0 %vm328_vm2, %v5274_v48 }
  0x7b   : > { %3810 = vmatprep.mubr.msk.f32.mxu1 %vm328_vm2, %v4791_v58  ;;  %4034 = vmatprep.mubr.msk.f32.mxu0 %vm328_vm2, %v5278_v35  ;;  %v5913_v35 = vld [vmem:[#allocation9_spill] sm:$0xff] }
  0x7e   : > { %3811 = vmatmul.mubr.msk.f32.gmra.mrb[14].mxu1 %vm328_vm2, %v4794_v59  ;;  %4035 = vmatmul.mubr.msk.f32.gmra.mrb[30].mxu0 %vm328_vm2, %v5289_v2  ;;  %v5912_v2 = vld [vmem:[#allocation8_spill] sm:$0xff] }
  0x7f   : > { %3813 = vmatprep.mubr.msk.f32.mxu1 %vm328_vm2, %v4817_v3  ;;  %4039 = vmatprep.mubr.msk.f32.mxu0 %vm328_vm2, %v4666_v15 }
  0x82   : > { %3814 = vmatmul.mubr.msk.f32.gmra.mrb[16].mxu1 %vm328_vm2, %v4820_v7  ;;  %4040 = vmatmul.mubr.msk.f32.vlgmr.msra.gmra.mrb[0].mxu0 %vm328_vm2, %v4671_v18 }
  0x83   : > { %3816 = vmatprep.mubr.msk.f32.mxu1 %vm328_vm2, %v4858_v28  ;;  %4088 = vmatpush3.msk.msra.mxu0 %vm393_vm0, %v4928_v30  ;;  %v915_v30 = vrot.slane %v4643_v4, 2  ;;  %v919_v4 = vsel %vm914_vm3, %v916_v38, %v918_v37  ;;  %v5910_v37 = vld [vmem:[#allocation39_spill] sm:$0xff] }
  0x84   : > { %4042 = vmatprep.mubr.msk.f32.mxu0 %vm328_vm2, %v4683_v25  ;;  %4137 = vmatprep.subr.msk.mxu0 %vm393_vm0, %v5304_v27 }
  0x85   : > { %v917_v62 = vsel %vm914_vm3, %v915_v30, %v916_v38  ;;  %v5909_v30 = vld [vmem:[#allocation35_spill] sm:$0xff] }
  0x86   : > { %3817 = vmatmul.mubr.msk.f32.gmra.mrb[18].mxu1 %vm328_vm2, %v4861_v29  ;;  %4043 = vmatmul.mubr.msk.f32.gmra.mrb[2].mxu0 %vm328_vm2, %v4686_v26  ;;  %v5428_v38 = vld [vmem:[%s4640_s5 + $0x198] sm:$0xff] }
  0x87   : > { %3819 = vmatprep.mubr.msk.f32.mxu1 %vm328_vm2, %v4886_v53  ;;  %4045 = vmatprep.mubr.msk.f32.mxu0 %vm328_vm2, %v4697_v31 }
  0x8a   : > { %3820 = vmatmul.mubr.msk.f32.gmra.mrb[20].mxu1 %vm328_vm2, %v4889_v55  ;;  %4046 = vmatmul.mubr.msk.f32.gmra.mrb[4].mxu0 %vm328_vm2, %v4700_v32 }
  0x8b   : > { %3822 = vmatprep.mubr.msk.f32.mxu1 %vm328_vm2, %v4918_v22  ;;  %4048 = vmatprep.mubr.msk.f32.mxu0 %vm328_vm2, %v4737_v42 }
  0x8e   : > { %3823 = vmatmul.mubr.msk.f32.gmra.mrb[22].mxu1 %vm328_vm2, %v4921_v24  ;;  %4049 = vmatmul.mubr.msk.f32.gmra.mrb[6].mxu0 %vm328_vm2, %v4740_v43 }
  0x8f   : > { %3825 = vmatprep.mubr.msk.f32.mxu1 %vm328_vm2, %v4960_v8  ;;  %4051 = vmatprep.mubr.msk.f32.mxu0 %vm328_vm2, %v4765_v50 }
  0x92   : > { %3826 = vmatmul.mubr.msk.f32.gmra.mrb[24].mxu1 %vm328_vm2, %v4963_v10  ;;  %4052 = vmatmul.mubr.msk.f32.gmra.mrb[8].mxu0 %vm328_vm2, %v4768_v51 }
  0x93   : > { %3828 = vmatprep.mubr.msk.f32.mxu1 %vm328_vm2, %v4997_v46  ;;  %4054 = vmatprep.mubr.msk.f32.mxu0 %vm328_vm2, %v4791_v58 }
  0x96   : > { %3829 = vmatmul.mubr.msk.f32.gmra.mrb[26].mxu1 %vm328_vm2, %v5000_v12  ;;  %4055 = vmatmul.mubr.msk.f32.gmra.mrb[10].mxu0 %vm328_vm2, %v4794_v59 }
  0x97   : > { %3831 = vmatprep.mubr.msk.f32.mxu1 %vm328_vm2, %v5032_v20  ;;  %4057 = vmatprep.mubr.msk.f32.mxu0 %vm328_vm2, %v4817_v3 }
  0x9a   : > { %3832 = vmatmul.mubr.msk.f32.gmra.mrb[28].mxu1 %vm328_vm2, %v5035_v54  ;;  %4058 = vmatmul.mubr.msk.f32.gmra.mrb[12].mxu0 %vm328_vm2, %v4820_v7 }
  0x9b   : > { %3834 = vmatprep.mubr.msk.f32.mxu1 %vm328_vm2, %v5067_v40  ;;  %4060 = vmatprep.mubr.msk.f32.mxu0 %vm328_vm2, %v4858_v28 }
  0x9e   : > { %3835 = vmatmul.mubr.msk.f32.gmra.mrb[30].mxu1 %vm328_vm2, %v5070_v44  ;;  %4061 = vmatmul.mubr.msk.f32.gmra.mrb[14].mxu0 %vm328_vm2, %v4861_v29 }
  0x9f   : > { %3839 = vmatprep.mubr.msk.f32.mxu1 %vm328_vm2, %v917_v62  ;;  %4063 = vmatprep.mubr.msk.f32.mxu0 %vm328_vm2, %v4886_v53  ;;  %v5439_v62 = vld [vmem:[%s4640_s5 + $0x1a0] sm:$0xff] }
  0xa2   : > { %3840 = vmatmul.mubr.msk.f32.vlgmr.msra.gmra.mrb[0].mxu1 %vm328_vm2, %v919_v4  ;;  %4064 = vmatmul.mubr.msk.f32.gmra.mrb[16].mxu0 %vm328_vm2, %v4889_v55  ;;  %v5911_v4 = vld [vmem:[#allocation7_spill] sm:$0xff] }
  0xa3   : > { %3888 = vmatpush3.msk.msra.mxu1 %vm393_vm0, %v5167_v23  ;;  %3842 = vmatprep.mubr.msk.f32.mxu1 %vm328_vm2, %v4881_v47  ;;  %v5905_v47 = vld [vmem:[#allocation27_spill] sm:$0xff] }
  0xa4   : > { %4066 = vmatprep.mubr.msk.f32.mxu0 %vm328_vm2, %v4918_v22  ;;  %4187 = vmatprep.subr.msk.mxu1 %vm393_vm0, %v4619_v1  ;;  %v5907_v23 = vld [vmem:[#allocation31_spill] sm:$0xff] }
  0xa6   : > { %3843 = vmatmul.mubr.msk.f32.gmra.mrb[2].mxu1 %vm328_vm2, %v4902_v63  ;;  %4067 = vmatmul.mubr.msk.f32.gmra.mrb[18].mxu0 %vm328_vm2, %v4921_v24  ;;  %v5906_v63 = vld [vmem:[#allocation29_spill] sm:$0xff] }
  0xa7   : > { %3845 = vmatprep.mubr.msk.f32.mxu1 %vm328_vm2, %v4913_v21  ;;  %4069 = vmatprep.mubr.msk.f32.mxu0 %vm328_vm2, %v4960_v8 }
  0xaa   : > { %3846 = vmatmul.mubr.msk.f32.gmra.mrb[4].mxu1 %vm328_vm2, %v5903_v5  ;;  %4070 = vmatmul.mubr.msk.f32.gmra.mrb[20].mxu0 %vm328_vm2, %v4963_v10 }
  0xab   : > { %3848 = vmatprep.mubr.msk.f32.mxu1 %vm328_vm2, %v5904_v11  ;;  %4072 = vmatprep.mubr.msk.f32.mxu0 %vm328_vm2, %v4997_v46 }
  0xae   : > { %3849 = vmatmul.mubr.msk.f32.gmra.mrb[6].mxu1 %vm328_vm2, %v5905_v47  ;;  %4073 = vmatmul.mubr.msk.f32.gmra.mrb[22].mxu0 %vm328_vm2, %v5000_v12 }
  0xaf   : > { %3851 = vmatprep.mubr.msk.f32.mxu1 %vm328_vm2, %v5906_v63  ;;  %4075 = vmatprep.mubr.msk.f32.mxu0 %vm328_vm2, %v5032_v20 }
  0xb2   : > { %3852 = vmatmul.mubr.msk.f32.gmra.mrb[8].mxu1 %vm328_vm2, %v5907_v23  ;;  %4076 = vmatmul.mubr.msk.f32.gmra.mrb[24].mxu0 %vm328_vm2, %v5035_v54 }
  0xb3   : > { %3854 = vmatprep.mubr.msk.f32.mxu1 %vm328_vm2, %v5908_v57  ;;  %4078 = vmatprep.mubr.msk.f32.mxu0 %vm328_vm2, %v5067_v40 }
  0xb6   : > { %3855 = vmatmul.mubr.msk.f32.gmra.mrb[10].mxu1 %vm328_vm2, %v5909_v30  ;;  %4079 = vmatmul.mubr.msk.f32.gmra.mrb[26].mxu0 %vm328_vm2, %v5070_v44  ;;  %v5914_v44 = vld [vmem:[#allocation10_spill] sm:$0xff] }
  0xb7   : > { %3857 = vmatprep.mubr.msk.f32.mxu1 %vm328_vm2, %v5062_v19  ;;  %4081 = vmatprep.mubr.msk.f32.mxu0 %vm328_vm2, %v5242_v9 }
  0xba   : > { %3858 = vmatmul.mubr.msk.f32.gmra.mrb[12].mxu1 %vm328_vm2, %v5910_v37  ;;  %4082 = vmatmul.mubr.msk.f32.gmra.mrb[28].mxu0 %vm328_vm2, %v5245_v6 }
  0xbb   : > { %3860 = vmatprep.mubr.msk.f32.mxu1 %vm328_vm2, %v5097_v39  ;;  %4084 = vmatprep.mubr.msk.f32.mxu0 %vm328_vm2, %v5428_v38 }
  0xbe   : > { %3861 = vmatmul.mubr.msk.f32.gmra.mrb[14].mxu1 %vm328_vm2, %v5114_v41  ;;  %4085 = vmatmul.mubr.msk.f32.gmra.mrb[30].mxu0 %vm328_vm2, %v5439_v62 }
  0xbf   : > { %3863 = vmatprep.mubr.msk.f32.mxu1 %vm328_vm2, %v5121_v13  ;;  %4089 = vmatprep.mubr.msk.f32.mxu0 %vm328_vm2, %v5911_v4  ;;  %v5915_v4 = vld [vmem:[#allocation11_spill] sm:$0xff] }
  0xc2   : > { %3864 = vmatmul.mubr.msk.f32.gmra.mrb[16].mxu1 %vm328_vm2, %v5137_v17  ;;  %4090 = vmatmul.mubr.msk.f32.vlgmr.msra.gmra.mrb[0].mxu0 %vm328_vm2, %v5912_v2  ;;  %v5916_v2 = vld [vmem:[#allocation12_spill] sm:$0xff] }
  0xc3   : > { %3866 = vmatprep.mubr.msk.f32.mxu1 %vm328_vm2, %v5141_v61  ;;  %4138 = vmatpush3.msk.msra.mxu0 %vm393_vm0, %v5304_v27  ;;  %v5919_v27 = vld [vmem:[#allocation15_spill] sm:$0xff] }
  0xc4   : > { %4092 = vmatprep.mubr.msk.f32.mxu0 %vm328_vm2, %v5913_v35  ;;  %v5917_v35 = vld [vmem:[#allocation13_spill] sm:$0xff] }
  0xc6   : > { %3867 = vmatmul.mubr.msk.f32.gmra.mrb[18].mxu1 %vm328_vm2, %v5154_v45  ;;  %4093 = vmatmul.mubr.msk.f32.gmra.mrb[2].mxu0 %vm328_vm2, %v5914_v44  ;;  %v5918_v44 = vld [vmem:[#allocation14_spill] sm:$0xff] }
  0xc7   : > { %3869 = vmatprep.mubr.msk.f32.mxu1 %vm328_vm2, %v5158_v0  ;;  %4095 = vmatprep.mubr.msk.f32.mxu0 %vm328_vm2, %v5915_v4  ;;  %v5920_v4 = vld [vmem:[#allocation45_spill] sm:$0xff] }
  0xca   : > { %3870 = vmatmul.mubr.msk.f32.gmra.mrb[20].mxu1 %vm328_vm2, %v5178_v16  ;;  %4096 = vmatmul.mubr.msk.f32.gmra.mrb[4].mxu0 %vm328_vm2, %v5916_v2  ;;  %v5921_v2 = vld [vmem:[#allocation16_spill] sm:$0xff] }
  0xcb   : > { %3872 = vmatprep.mubr.msk.f32.mxu1 %vm328_vm2, %v5182_v49  ;;  %4098 = vmatprep.mubr.msk.f32.mxu0 %vm328_vm2, %v5917_v35  ;;  %v5922_v49 = vld [vmem:[#allocation46_spill] sm:$0xff]  ;;  %v5923_v35 = vld [vmem:[#allocation17_spill] sm:$0xff] }
  0xce   : > { %3873 = vmatmul.mubr.msk.f32.gmra.mrb[22].mxu1 %vm328_vm2, %v5197_v56  ;;  %4099 = vmatmul.mubr.msk.f32.gmra.mrb[6].mxu0 %vm328_vm2, %v5918_v44  ;;  %v5924_v44 = vld [vmem:[#allocation18_spill] sm:$0xff] }
  0xcf   : > { %3875 = vmatprep.mubr.msk.f32.mxu1 %vm328_vm2, %v5201_v14  ;;  %4101 = vmatprep.mubr.msk.f32.mxu0 %vm328_vm2, %v5919_v27  ;;  %v5925_v27 = vld [vmem:[#allocation19_spill] sm:$0xff] }
  0xd2   : > { %3876 = vmatmul.mubr.msk.f32.gmra.mrb[24].mxu1 %vm328_vm2, %v5920_v4  ;;  %4102 = vmatmul.mubr.msk.f32.gmra.mrb[8].mxu0 %vm328_vm2, %v5921_v2  ;;  %v5926_v2 = vld [vmem:[#allocation20_spill] sm:$0xff] }
  0xd3   : > { %3878 = vmatprep.mubr.msk.f32.mxu1 %vm328_vm2, %v5922_v49  ;;  %4104 = vmatprep.mubr.msk.f32.mxu0 %vm328_vm2, %v5923_v35  ;;  %v5927_v35 = vld [vmem:[#allocation21_spill] sm:$0xff] }
  0xd6   : > { %3879 = vmatmul.mubr.msk.f32.gmra.mrb[26].mxu1 %vm328_vm2, %v5231_v36  ;;  %4105 = vmatmul.mubr.msk.f32.gmra.mrb[10].mxu0 %vm328_vm2, %v5924_v44  ;;  %v5928_v44 = vld [vmem:[#allocation22_spill] sm:$0xff]  ;;  %v5566_v36 = vld [vmem:[%s4640_s5 + $0x1a8] sm:$0x3]  ;;  %s3053_s5 = scalar_lea.sflag [#allocation3], %s134_s25 }
  0xd7   : > { %3881 = vmatprep.mubr.msk.f32.mxu1 %vm328_vm2, %v5235_v34  ;;  %4107 = vmatprep.mubr.msk.f32.mxu0 %vm328_vm2, %v5925_v27  ;;  %v5929_v34 = vld [vmem:[#allocation5_spill] sm:$0xff]  ;;  %v5930_v27 = vld [vmem:[#allocation24_spill] sm:$0xff] }
  0xda   : > { %3882 = vmatmul.mubr.msk.f32.gmra.mrb[28].mxu1 %vm328_vm2, %v5254_v60  ;;  %4108 = vmatmul.mubr.msk.f32.gmra.mrb[12].mxu0 %vm328_vm2, %v5926_v2  ;;  %v5931_v60 = vld [vmem:[#allocation6_spill] sm:$0xff] }
  0xdb   : > { %3884 = vmatprep.mubr.msk.f32.mxu1 %vm328_vm2, %v5258_v33  ;;  %4110 = vmatprep.mubr.msk.f32.mxu0 %vm328_vm2, %v5927_v35  ;;  %v5932_v2 = vld [vmem:[#allocation26_spill] sm:$0xff]  ;;  %v5940_v33 = vld [vmem:[#allocation41_spill] sm:$0xff] }
  0xde   : > { %3885 = vmatmul.mubr.msk.f32.gmra.mrb[30].mxu1 %vm328_vm2, %v5274_v48  ;;  %4111 = vmatmul.mubr.msk.f32.gmra.mrb[14].mxu0 %vm328_vm2, %v5928_v44  ;;  %v5933_v48 = vld [vmem:[#allocation28_spill] sm:$0xff] }
  0xdf   : > { %3889 = vmatprep.mubr.msk.f32.mxu1 %vm328_vm2, %v5929_v34  ;;  %4113 = vmatprep.mubr.msk.f32.mxu0 %vm328_vm2, %v5930_v27  ;;  %v5934_v34 = vld [vmem:[#allocation30_spill] sm:$0xff] }
  0xe2   : > { %3890 = vmatmul.mubr.msk.f32.vlgmr.msra.gmra.mrb[0].mxu1 %vm328_vm2, %v5931_v60  ;;  %4114 = vmatmul.mubr.msk.f32.gmra.mrb[16].mxu0 %vm328_vm2, %v5932_v2  ;;  %v5935_v60 = vld [vmem:[#allocation32_spill] sm:$0xff] }
  0xe3   : > { %4188 = vmatpush3.msk.msra.mxu1 %vm393_vm0, %v4619_v1  ;;  %3892 = vmatprep.mubr.msk.f32.mxu1 %vm328_vm2, %v4666_v15  ;;  %v5936_v1 = vld [vmem:[#allocation34_spill] sm:$0xff]  ;;  %v5937_v15 = vld [vmem:[#allocation36_spill] sm:$0xff] }
  0xe4   : > { %4116 = vmatprep.mubr.msk.f32.mxu0 %vm328_vm2, %v5933_v48 }
  0xe6   : > { %3893 = vmatmul.mubr.msk.f32.gmra.mrb[2].mxu1 %vm328_vm2, %v4671_v18  ;;  %4117 = vmatmul.mubr.msk.f32.gmra.mrb[18].mxu0 %vm328_vm2, %v5934_v34  ;;  %v5938_v18 = vld [vmem:[#allocation38_spill] sm:$0xff] }
  0xe7   : > { %3895 = vmatprep.mubr.msk.f32.mxu1 %vm328_vm2, %v4683_v25  ;;  %4119 = vmatprep.mubr.msk.f32.mxu0 %vm328_vm2, %v5935_v60  ;;  %v5939_v25 = vld [vmem:[#allocation40_spill] sm:$0xff] }
  0xea   : > { %3896 = vmatmul.mubr.msk.f32.gmra.mrb[4].mxu1 %vm328_vm2, %v4686_v26  ;;  %4120 = vmatmul.mubr.msk.f32.gmra.mrb[20].mxu0 %vm328_vm2, %v5936_v1  ;;  %v1590_v26 = vrot.slane %v5242_v9, 1 }
  0xeb   : > { %3898 = vmatprep.mubr.msk.f32.mxu1 %vm328_vm2, %v4697_v31  ;;  %4122 = vmatprep.mubr.msk.f32.mxu0 %vm328_vm2, %v5937_v15  ;;  %v1591_v31 = vrot.slane %v5245_v6, 1 }
  0xed   : > { %v5563_v15 = vsel %vm245_vm1, %v1590_v26, %v1591_v31 }
  0xee   : > { %3899 = vmatmul.mubr.msk.f32.gmra.mrb[6].mxu1 %vm328_vm2, %v4700_v32  ;;  %4123 = vmatmul.mubr.msk.f32.gmra.mrb[22].mxu0 %vm328_vm2, %v5938_v18  ;;  %v5941_v32 = vld [vmem:[#allocation42_spill] sm:$0xff]  ;;  %v2402_v18 = vrot.slane %v5439_v62, 1 }
  0xef   : > { %3901 = vmatprep.mubr.msk.f32.mxu1 %vm328_vm2, %v4737_v42  ;;  %4125 = vmatprep.mubr.msk.f32.mxu0 %vm328_vm2, %v5939_v25  ;;  %v1593_v42 = vrot.slane %v5263_v52, 1  ;;  %v2401_v25 = vrot.slane %v5428_v38, 1  ;;  %v2404_v52 = vrot.slane %v5566_v36, 1 }
  0xf1   : > { %v2403_v26 = vsel %vm245_vm1, %v2401_v25, %v2402_v18 }
  0xf2   : > { %3902 = vmatmul.mubr.msk.f32.gmra.mrb[8].mxu1 %vm328_vm2, %v4740_v43  ;;  %4126 = vmatmul.mubr.msk.f32.gmra.mrb[24].mxu0 %vm328_vm2, %v5940_v33  ;;  %v5942_v43 = vld [vmem:[#allocation43_spill] sm:$0xff] }
  0xf3   : > { %3904 = vmatprep.mubr.msk.f32.mxu1 %vm328_vm2, %v4765_v50  ;;  %4128 = vmatprep.mubr.msk.f32.mxu0 %vm328_vm2, %v5941_v32  ;;  %v5577_v50 = vsel %vm245_vm1, %v1591_v31, %v1593_v42 }
  0xf6   : > { %3905 = vmatmul.mubr.msk.f32.gmra.mrb[10].mxu1 %vm328_vm2, %v4768_v51  ;;  %4129 = vmatmul.mubr.msk.f32.gmra.mrb[26].mxu0 %vm328_vm2, %v5942_v43  ;;  %v2405_v51 = vsel %vm245_vm1, %v2402_v18, %v2404_v52 }
  0xf7   : > { %3907 = vmatprep.mubr.msk.f32.mxu1 %vm328_vm2, %v4791_v58  ;;  %4131 = vmatprep.mubr.msk.f32.mxu0 %vm328_vm2, %v5563_v15  ;;  %v5946_v58 = vld [vmem:[#allocation36_spill] sm:$0xff] }
  0xfa   : > { %3908 = vmatmul.mubr.msk.f32.gmra.mrb[12].mxu1 %vm328_vm2, %v4794_v59  ;;  %4132 = vmatmul.mubr.msk.f32.gmra.mrb[28].mxu0 %vm328_vm2, %v5577_v50  ;;  %v5947_v59 = vld [vmem:[#allocation48_spill] sm:$0xff] }
  0xfb   : > { %3910 = vmatprep.mubr.msk.f32.mxu1 %vm328_vm2, %v4817_v3  ;;  %4134 = vmatprep.mubr.msk.f32.mxu0 %vm328_vm2, %v2403_v26  ;;  %v5948_v3 = vld [vmem:[#allocation38_spill] sm:$0xff] }
  0xfe   : > { %3911 = vmatmul.mubr.msk.f32.gmra.mrb[14].mxu1 %vm328_vm2, %v4820_v7  ;;  %4135 = vmatmul.mubr.msk.f32.gmra.mrb[30].mxu0 %vm328_vm2, %v2405_v51  ;;  %v5949_v7 = vld [vmem:[#allocation49_spill] sm:$0xff] }
  0xff   : > { %3913 = vmatprep.mubr.msk.f32.mxu1 %vm328_vm2, %v4858_v28  ;;  %4139 = vmatprep.mubr.msk.f32.mxu0 %vm328_vm2, %v4913_v21  ;;  %v2672_v28 = vrot.slane %v5428_v38, 2  ;;  %v2675_v21 = vrot.slane %v5566_v36, 2 }
 0x102   : > { %3914 = vmatmul.mubr.msk.f32.gmra.mrb[16].mxu1 %vm328_vm2, %v4861_v29  ;;  %4140 = vmatmul.mubr.msk.f32.vlgmr.msra.gmra.mrb[0].mxu0 %vm328_vm2, %v5903_v5  ;;  %v2673_v29 = vrot.slane %v5439_v62, 2 }
 0x103   : > { %3916 = vmatprep.mubr.msk.f32.mxu1 %vm328_vm2, %v4886_v53  ;;  %4142 = vmatprep.mubr.msk.f32.mxu0 %vm328_vm2, %v5904_v11  ;;  %v5952_v53 = vld [vmem:[#allocation51_spill] sm:$0xff] }
 0x106   : > { %3917 = vmatmul.mubr.msk.f32.gmra.mrb[18].mxu1 %vm328_vm2, %v4889_v55  ;;  %4143 = vmatmul.mubr.msk.f32.gmra.mrb[2].mxu0 %vm328_vm2, %v5905_v47  ;;  %v5953_v55 = vld [vmem:[#allocation52_spill] sm:$0xff] }
 0x107   : > { %3919 = vmatprep.mubr.msk.f32.mxu1 %vm328_vm2, %v4918_v22  ;;  %4145 = vmatprep.mubr.msk.f32.mxu0 %vm328_vm2, %v5906_v63  ;;  %v5951_v22 = vld [vmem:[#allocation50_spill] sm:$0xff] }
 0x10a   : > { %3920 = vmatmul.mubr.msk.f32.gmra.mrb[20].mxu1 %vm328_vm2, %v4921_v24  ;;  %4146 = vmatmul.mubr.msk.f32.gmra.mrb[4].mxu0 %vm328_vm2, %v5907_v23  ;;  %v2674_v24 = vsel %vm914_vm3, %v2672_v28, %v2673_v29 }
 0x10b   : > { %3922 = vmatprep.mubr.msk.f32.mxu1 %vm328_vm2, %v4960_v8  ;;  %4148 = vmatprep.mubr.msk.f32.mxu0 %vm328_vm2, %v5908_v57  ;;  %v5950_v8 = vld [vmem:[#allocation40_spill] sm:$0xff] }
 0x10e   : > { %3923 = vmatmul.mubr.msk.f32.gmra.mrb[22].mxu1 %vm328_vm2, %v4963_v10  ;;  %4149 = vmatmul.mubr.msk.f32.gmra.mrb[6].mxu0 %vm328_vm2, %v5909_v30  ;;  %v5954_v10 = vld [vmem:[#allocation53_spill] sm:$0xff] }
 0x10f   : > { %3925 = vmatprep.mubr.msk.f32.mxu1 %vm328_vm2, %v4997_v46  ;;  %4151 = vmatprep.mubr.msk.f32.mxu0 %vm328_vm2, %v5062_v19  ;;  %v5943_v46 = vld [vmem:[#allocation37_spill] sm:$0xff] }
 0x112   : > { %3926 = vmatmul.mubr.msk.f32.gmra.mrb[24].mxu1 %vm328_vm2, %v5000_v12  ;;  %4152 = vmatmul.mubr.msk.f32.gmra.mrb[8].mxu0 %vm328_vm2, %v5910_v37  ;;  %v2676_v12 = vsel %vm914_vm3, %v2673_v29, %v2675_v21 }
 0x113   : > { %3928 = vmatprep.mubr.msk.f32.mxu1 %vm328_vm2, %v5032_v20  ;;  %4154 = vmatprep.mubr.msk.f32.mxu0 %vm328_vm2, %v5097_v39 }
 0x116   : > { %3929 = vmatmul.mubr.msk.f32.gmra.mrb[26].mxu1 %vm328_vm2, %v5035_v54  ;;  %4155 = vmatmul.mubr.msk.f32.gmra.mrb[10].mxu0 %vm328_vm2, %v5114_v41 }
 0x117   : > { %3931 = vmatprep.mubr.msk.f32.mxu1 %vm328_vm2, %v5067_v40  ;;  %4157 = vmatprep.mubr.msk.f32.mxu0 %vm328_vm2, %v5121_v13 }
 0x11a   : > { %3932 = vmatmul.mubr.msk.f32.gmra.mrb[28].mxu1 %vm328_vm2, %v5943_v46  ;;  %4158 = vmatmul.mubr.msk.f32.gmra.mrb[12].mxu0 %vm328_vm2, %v5137_v17 }
 0x11b   : > { %3934 = vmatprep.mubr.msk.f32.mxu1 %vm328_vm2, %v5242_v9  ;;  %4160 = vmatprep.mubr.msk.f32.mxu0 %vm328_vm2, %v5141_v61  ;;  %v5944_v9 = vld [vmem:[#allocation44_spill] sm:$0xff] }
 0x11e   : > { %3935 = vmatmul.mubr.msk.f32.gmra.mrb[30].mxu1 %vm328_vm2, %v5245_v6  ;;  %4161 = vmatmul.mubr.msk.f32.gmra.mrb[14].mxu0 %vm328_vm2, %v5154_v45  ;;  %v5945_v6 = vld [vmem:[#allocation47_spill] sm:$0xff] }
 0x11f   : > { %3963 = vmatprep.mubr.msk.f32.mxu1 %vm328_vm2, %v5927_v35  ;;  %4163 = vmatprep.mubr.msk.f32.mxu0 %vm328_vm2, %v5158_v0 }
 0x122   : > { %3964 = vmatmul.mubr.msk.f32.vlgmr.msra.gmra.mrb[16].mxu1 %vm328_vm2, %v5928_v44  ;;  %4164 = vmatmul.mubr.msk.f32.gmra.mrb[16].mxu0 %vm328_vm2, %v5178_v16 }
 0x123   : > { %3966 = vmatprep.mubr.msk.f32.mxu1 %vm328_vm2, %v5930_v27  ;;  %4166 = vmatprep.mubr.msk.f32.mxu0 %vm328_vm2, %v5944_v9 }
 0x126   : > { %3967 = vmatmul.mubr.msk.f32.gmra.mrb[18].mxu1 %vm328_vm2, %v5932_v2  ;;  %4167 = vmatmul.mubr.msk.f32.gmra.mrb[18].mxu0 %vm328_vm2, %v5197_v56 }
 0x127   : > { %3969 = vmatprep.mubr.msk.f32.mxu1 %vm328_vm2, %v5933_v48  ;;  %4169 = vmatprep.mubr.msk.f32.mxu0 %vm328_vm2, %v5201_v14 }
 0x12a   : > { %3970 = vmatmul.mubr.msk.f32.gmra.mrb[20].mxu1 %vm328_vm2, %v5934_v34  ;;  %4170 = vmatmul.mubr.msk.f32.gmra.mrb[20].mxu0 %vm328_vm2, %v5920_v4 }
 0x12b   : > { %3972 = vmatprep.mubr.msk.f32.mxu1 %vm328_vm2, %v5935_v60  ;;  %4172 = vmatprep.mubr.msk.f32.mxu0 %vm328_vm2, %v5922_v49 }
 0x12e   : > { %3973 = vmatmul.mubr.msk.f32.gmra.mrb[22].mxu1 %vm328_vm2, %v5936_v1  ;;  %4173 = vmatmul.mubr.msk.f32.gmra.mrb[22].mxu0 %vm328_vm2, %v5945_v6 }
 0x12f   : > { %3975 = vmatprep.mubr.msk.f32.mxu1 %vm328_vm2, %v5946_v58  ;;  %4175 = vmatprep.mubr.msk.f32.mxu0 %vm328_vm2, %v5947_v59 }
 0x132   : > { %3976 = vmatmul.mubr.msk.f32.gmra.mrb[24].mxu1 %vm328_vm2, %v5948_v3  ;;  %4176 = vmatmul.mubr.msk.f32.gmra.mrb[24].mxu0 %vm328_vm2, %v5949_v7 }
 0x133   : > { %3978 = vmatprep.mubr.msk.f32.mxu1 %vm328_vm2, %v5950_v8  ;;  %4178 = vmatprep.mubr.msk.f32.mxu0 %vm328_vm2, %v5951_v22 }
 0x136   : > { %3979 = vmatmul.mubr.msk.f32.gmra.mrb[26].mxu1 %vm328_vm2, %v5940_v33  ;;  %4179 = vmatmul.mubr.msk.f32.gmra.mrb[26].mxu0 %vm328_vm2, %v5952_v53 }
 0x137   : > { %3981 = vmatprep.mubr.msk.f32.mxu1 %vm328_vm2, %v5941_v32  ;;  %4181 = vmatprep.mubr.msk.f32.mxu0 %vm328_vm2, %v5953_v55 }
 0x13a   : > { %3982 = vmatmul.mubr.msk.f32.gmra.mrb[28].mxu1 %vm328_vm2, %v5942_v43  ;;  %4182 = vmatmul.mubr.msk.f32.gmra.mrb[28].mxu0 %vm328_vm2, %v5954_v10 }
 0x13b   : > { %3984 = vmatprep.mubr.msk.f32.mxu1 %vm328_vm2, %v5563_v15  ;;  %4184 = vmatprep.mubr.msk.f32.mxu0 %vm328_vm2, %v2674_v24 }
 0x13e   : > { %3985 = vmatmul.mubr.msk.f32.gmra.mrb[30].mxu1 %vm328_vm2, %v5577_v50  ;;  %4185 = vmatmul.mubr.msk.f32.gmra.mrb[30].mxu0 %vm328_vm2, %v2676_v12 }
 0x1b5   : > { %v3891_v40 = vpop.f32.mrb[0].mxu1 }
 0x1b6   : > { %v1398_v20 = vpop.f32.mrb[1].mxu1 }
 0x1b9   : > { %v3894_v54 = vpop.f32.mrb[2].mxu1 }
 0x1ba   : > { %v1408_v19 = vpop.f32.mrb[3].mxu1 }
 0x1bd   : > { %v3897_v13 = vpop.f32.mrb[4].mxu1 }
 0x1be   : > { %v1418_v39 = vpop.f32.mrb[5].mxu1 }
 0x1c1   : > { %v3900_v41 = vpop.f32.mrb[6].mxu1 }
 0x1c2   : > { %v1428_v17 = vpop.f32.mrb[7].mxu1 }
 0x1c5   : > { %v3903_v61 = vpop.f32.mrb[8].mxu1 }
 0x1c6   : > { %v1438_v45 = vpop.f32.mrb[9].mxu1 }
 0x1c9   : > { %v3906_v0 = vpop.f32.mrb[10].mxu1 }
 0x1ca   : > { %v1448_v16 = vpop.f32.mrb[11].mxu1 }
 0x1cd   : > { %v3909_v49 = vpop.f32.mrb[12].mxu1 }
 0x1ce   : > { %v1458_v56 = vpop.f32.mrb[13].mxu1 }
 0x1d1   : > { %v5723_v14 = vpop.f32.mrb[14].mxu1 }
 0x1d2   : > { %v5725_v36 = vpop.f32.mrb[15].mxu1 }
 0x1d5   : > { %v4141_v33 = vpop.f32.mrb[0].mxu0 }
 0x1d6   : > { %v4189_v48 = vadd.f32 %v4141_v33, %v3891_v40  ;;  %v2752_v5 = vpop.f32.mrb[1].mxu0 }
 0x1d7   : > { %v4190_v11 = vadd.f32 %v2752_v5, %v1398_v20 }
 0x1d8   : > { %v2981_v47 = vmul.f32 %v4189_v48, %v4189_v48 }
 0x1d9   : > { %v2943_v63 = vadd.f32 %v4190_v11, %v4189_v48  ;;  %v2980_v23 = vmul.f32 %v4190_v11, %v4190_v11  ;;  %v4144_v57 = vpop.f32.mrb[2].mxu0 }
 0x1da   : > { %v4191_v30 = vadd.f32 %v4144_v57, %v3894_v54  ;;  %v2762_v38 = vpop.f32.mrb[3].mxu0 }
 0x1db   : > { %v3012_v37 = vadd.f32 %v2981_v47, %v2980_v23  ;;  %v4192_v62 = vadd.f32 %v2762_v38, %v1408_v19 }
 0x1dc   : > { %v2983_v34 = vmul.f32 %v4191_v30, %v4191_v30 }
 0x1dd   : > { %v2944_v4 = vadd.f32 %v4192_v62, %v2943_v63  ;;  %v2982_v35 = vmul.f32 %v4192_v62, %v4192_v62  ;;  %v4147_v44 = vpop.f32.mrb[4].mxu0 }
 0x1de   : > { %v4193_v27 = vadd.f32 %v4147_v44, %v3897_v13  ;;  %v2772_v2 = vpop.f32.mrb[5].mxu0 }
 0x1df   : > { %v3013_v60 = vadd.f32 %v3012_v37, %v2982_v35  ;;  %v4194_v1 = vadd.f32 %v2772_v2, %v1418_v39  ;;  %v2945_v15 = vadd.f32 %v4191_v30, %v2944_v4 }
 0x1e0   : > { %v2985_v50 = vmul.f32 %v4193_v27, %v4193_v27 }
 0x1e1   : > { %v2946_v18 = vadd.f32 %v4194_v1, %v2945_v15  ;;  %v2984_v25 = vmul.f32 %v4194_v1, %v4194_v1  ;;  %v3014_v31 = vadd.f32 %v3013_v60, %v2983_v34  ;;  %v4150_v32 = vpop.f32.mrb[6].mxu0 }
 0x1e2   : > { %v4195_v42 = vadd.f32 %v4150_v32, %v3900_v41  ;;  %v2782_v43 = vpop.f32.mrb[7].mxu0 }
 0x1e3   : > { %v3015_v52 = vadd.f32 %v3014_v31, %v2984_v25  ;;  %v4196_v26 = vadd.f32 %v2782_v43, %v1428_v17  ;;  %v2947_v51 = vadd.f32 %v4193_v27, %v2946_v18 }
 0x1e4   : > { %v2987_v7 = vmul.f32 %v4195_v42, %v4195_v42 }
 0x1e5   : > { %v2948_v46 = vadd.f32 %v4196_v26, %v2947_v51  ;;  %v2986_v9 = vmul.f32 %v4196_v26, %v4196_v26  ;;  %v3016_v6 = vadd.f32 %v3015_v52, %v2985_v50  ;;  %v4153_v58 = vpop.f32.mrb[8].mxu0 }
 0x1e6   : > { %v4197_v59 = vadd.f32 %v4153_v58, %v3903_v61  ;;  %v2792_v3 = vpop.f32.mrb[9].mxu0 }
 0x1e7   : > { %v3017_v8 = vadd.f32 %v3016_v6, %v2986_v9  ;;  %v4198_v22 = vadd.f32 %v2792_v3, %v1438_v45  ;;  %v2949_v28 = vadd.f32 %v4195_v42, %v2948_v46 }
 0x1e8   : > { %v2989_v12 = vmul.f32 %v4197_v59, %v4197_v59 }
 0x1e9   : > { %v2950_v29 = vadd.f32 %v4198_v22, %v2949_v28  ;;  %v2988_v53 = vmul.f32 %v4198_v22, %v4198_v22  ;;  %v3018_v55 = vadd.f32 %v3017_v8, %v2987_v7  ;;  %v4156_v21 = vpop.f32.mrb[10].mxu0 }
 0x1ea   : > { %v4199_v24 = vadd.f32 %v4156_v21, %v3906_v0  ;;  %v2802_v10 = vpop.f32.mrb[11].mxu0 }
 0x1eb   : > { %v3019_v40 = vadd.f32 %v3018_v55, %v2988_v53  ;;  %v4200_v20 = vadd.f32 %v2802_v10, %v1448_v16  ;;  %v2951_v54 = vadd.f32 %v4197_v59, %v2950_v29 }
 0x1ec   : > { %v2991_v33 = vmul.f32 %v4199_v24, %v4199_v24 }
 0x1ed   : > { %v2952_v19 = vadd.f32 %v4200_v20, %v2951_v54  ;;  %v2990_v13 = vmul.f32 %v4200_v20, %v4200_v20  ;;  %v3020_v39 = vadd.f32 %v3019_v40, %v2989_v12  ;;  %v4159_v41 = vpop.f32.mrb[12].mxu0 }
 0x1ee   : > { %v4201_v17 = vadd.f32 %v4159_v41, %v3909_v49  ;;  %v2812_v61 = vpop.f32.mrb[13].mxu0 }
 0x1ef   : > { %v3021_v48 = vadd.f32 %v3020_v39, %v2990_v13  ;;  %v4202_v45 = vadd.f32 %v2812_v61, %v1458_v56  ;;  %v2953_v5 = vadd.f32 %v4199_v24, %v2952_v19 }
 0x1f0   : > { %v2993_v30 = vmul.f32 %v4201_v17, %v4201_v17 }
 0x1f1   : > { %v2954_v11 = vadd.f32 %v4202_v45, %v2953_v5  ;;  %v2992_v47 = vmul.f32 %v4202_v45, %v4202_v45  ;;  %v3022_v63 = vadd.f32 %v3021_v48, %v2991_v33  ;;  %v4162_v23 = vpop.f32.mrb[14].mxu0 }
 0x1f2   : > { %v4203_v0 = vadd.f32 %v4162_v23, %v5723_v14  ;;  %v2822_v57 = vpop.f32.mrb[15].mxu0 }
 0x1f3   : > { %v3023_v16 = vadd.f32 %v3022_v63, %v2992_v47  ;;  %v4204_v38 = vadd.f32 %v2822_v57, %v5725_v36  ;;  %v2955_v37 = vadd.f32 %v4201_v17, %v2954_v11 }
 0x1f4   : > { %v2995_v34 = vmul.f32 %v4203_v0, %v4203_v0 }
 0x1f5   : > { %v3965_v62 = vpop.f32.mrb[16].mxu1  ;;  %v2956_v4 = vadd.f32 %v4204_v38, %v2955_v37  ;;  %v2994_v49 = vmul.f32 %v4204_v38, %v4204_v38  ;;  %v3024_v35 = vadd.f32 %v3023_v16, %v2993_v30  ;;  %v4165_v44 = vpop.f32.mrb[16].mxu0 }
 0x1f6   : > { %v1750_v27 = vpop.f32.mrb[17].mxu1  ;;  %v4205_v56 = vadd.f32 %v4165_v44, %v3965_v62  ;;  %v2832_v2 = vpop.f32.mrb[17].mxu0 }
 0x1f7   : > { %v3025_v60 = vadd.f32 %v3024_v35, %v2994_v49  ;;  %v4206_v1 = vadd.f32 %v2832_v2, %v1750_v27  ;;  %v2957_v15 = vadd.f32 %v4203_v0, %v2956_v4 }
 0x1f8   : > { %v2997_v50 = vmul.f32 %v4205_v56, %v4205_v56 }
 0x1f9   : > { %v3968_v18 = vpop.f32.mrb[18].mxu1  ;;  %v2958_v14 = vadd.f32 %v4206_v1, %v2957_v15  ;;  %v2996_v25 = vmul.f32 %v4206_v1, %v4206_v1  ;;  %v3026_v31 = vadd.f32 %v3025_v60, %v2995_v34  ;;  %v4168_v32 = vpop.f32.mrb[18].mxu0 }
 0x1fa   : > { %v1760_v42 = vpop.f32.mrb[19].mxu1  ;;  %v4207_v36 = vadd.f32 %v4168_v32, %v3968_v18  ;;  %v2842_v43 = vpop.f32.mrb[19].mxu0 }
 0x1fb   : > { %v3027_v52 = vadd.f32 %v3026_v31, %v2996_v25  ;;  %v4208_v26 = vadd.f32 %v2842_v43, %v1760_v42  ;;  %v2959_v51 = vadd.f32 %v4205_v56, %v2958_v14 }
 0x1fc   : > { %v2999_v22 = vmul.f32 %v4207_v36, %v4207_v36 }
 0x1fd   : > { %v3971_v46 = vpop.f32.mrb[20].mxu1  ;;  %v2960_v9 = vadd.f32 %v4208_v26, %v2959_v51  ;;  %v2998_v6 = vmul.f32 %v4208_v26, %v4208_v26  ;;  %v3028_v58 = vadd.f32 %v3027_v52, %v2997_v50  ;;  %v4171_v59 = vpop.f32.mrb[20].mxu0 }
 0x1fe   : > { %v1770_v3 = vpop.f32.mrb[21].mxu1  ;;  %v4209_v7 = vadd.f32 %v4171_v59, %v3971_v46  ;;  %v2852_v8 = vpop.f32.mrb[21].mxu0 }
 0x1ff   : > { %v3029_v28 = vadd.f32 %v3028_v58, %v2998_v6  ;;  %v4210_v29 = vadd.f32 %v2852_v8, %v1770_v3  ;;  %v2961_v53 = vadd.f32 %v4207_v36, %v2960_v9 }
 0x200   : > { %v3001_v19 = vmul.f32 %v4209_v7, %v4209_v7 }
 0x201   : > { %v3974_v55 = vpop.f32.mrb[22].mxu1  ;;  %v2962_v21 = vadd.f32 %v4210_v29, %v2961_v53  ;;  %v3000_v24 = vmul.f32 %v4210_v29, %v4210_v29  ;;  %v3030_v10 = vadd.f32 %v3029_v28, %v2999_v22  ;;  %v4174_v12 = vpop.f32.mrb[22].mxu0 }
 0x202   : > { %v1780_v40 = vpop.f32.mrb[23].mxu1  ;;  %v4211_v20 = vadd.f32 %v4174_v12, %v3974_v55  ;;  %v2862_v54 = vpop.f32.mrb[23].mxu0 }
 0x203   : > { %v3031_v13 = vadd.f32 %v3030_v10, %v3000_v24  ;;  %v4212_v39 = vadd.f32 %v2862_v54, %v1780_v40  ;;  %v2963_v41 = vadd.f32 %v4209_v7, %v2962_v21 }
 0x204   : > { %v3003_v63 = vmul.f32 %v4211_v20, %v4211_v20 }
 0x205   : > { %v3977_v17 = vpop.f32.mrb[24].mxu1  ;;  %v2964_v61 = vadd.f32 %v4212_v39, %v2963_v41  ;;  %v3002_v33 = vmul.f32 %v4212_v39, %v4212_v39  ;;  %v3032_v48 = vadd.f32 %v3031_v13, %v3001_v19  ;;  %v4177_v45 = vpop.f32.mrb[24].mxu0 }
 0x206   : > { %v1790_v5 = vpop.f32.mrb[25].mxu1  ;;  %v4213_v11 = vadd.f32 %v4177_v45, %v3977_v17  ;;  %v2872_v47 = vpop.f32.mrb[25].mxu0 }
 0x207   : > { %v3033_v23 = vadd.f32 %v3032_v48, %v3002_v33  ;;  %v4214_v0 = vadd.f32 %v2872_v47, %v1790_v5  ;;  %v2965_v57 = vadd.f32 %v4211_v20, %v2964_v61 }
 0x208   : > { %v3005_v44 = vmul.f32 %v4213_v11, %v4213_v11 }
 0x209   : > { %v3980_v30 = vpop.f32.mrb[26].mxu1  ;;  %v2966_v16 = vadd.f32 %v4214_v0, %v2965_v57  ;;  %v3004_v38 = vmul.f32 %v4214_v0, %v4214_v0  ;;  %v3034_v37 = vadd.f32 %v3033_v23, %v3003_v63  ;;  %v4180_v62 = vpop.f32.mrb[26].mxu0 }
 0x20a   : > { %v1800_v4 = vpop.f32.mrb[27].mxu1  ;;  %v4215_v49 = vadd.f32 %v4180_v62, %v3980_v30  ;;  %v2882_v35 = vpop.f32.mrb[27].mxu0 }
 0x20b   : > { %v3035_v27 = vadd.f32 %v3034_v37, %v3004_v38  ;;  %v4216_v56 = vadd.f32 %v2882_v35, %v1800_v4  ;;  %v2967_v2 = vadd.f32 %v4213_v11, %v2966_v16 }
 0x20c   : > { %v3007_v32 = vmul.f32 %v4215_v49, %v4215_v49 }
 0x20d   : > { %v3983_v34 = vpop.f32.mrb[28].mxu1  ;;  %v2968_v60 = vadd.f32 %v4216_v56, %v2967_v2  ;;  %v3006_v1 = vmul.f32 %v4216_v56, %v4216_v56  ;;  %v3036_v15 = vadd.f32 %v3035_v27, %v3005_v44  ;;  %v4183_v18 = vpop.f32.mrb[28].mxu0 }
 0x20e   : > { %v1810_v14 = vpop.f32.mrb[29].mxu1  ;;  %v4217_v25 = vadd.f32 %v4183_v18, %v3983_v34  ;;  %v2892_v31 = vpop.f32.mrb[29].mxu0 }
 0x20f   : > { %v3037_v42 = vadd.f32 %v3036_v15, %v3006_v1  ;;  %v4218_v36 = vadd.f32 %v2892_v31, %v1810_v14  ;;  %v2969_v43 = vadd.f32 %v4215_v49, %v2968_v60 }
 0x210   : > { %v3009_v59 = vmul.f32 %v4217_v25, %v4217_v25 }
 0x211   : > { %v3986_v50 = vpop.f32.mrb[30].mxu1  ;;  %v2970_v52 = vadd.f32 %v4218_v36, %v2969_v43  ;;  %v3008_v26 = vmul.f32 %v4218_v36, %v4218_v36  ;;  %v3038_v51 = vadd.f32 %v3037_v42, %v3007_v32  ;;  %v4186_v46 = vpop.f32.mrb[30].mxu0 }
 0x212   : > { %v1820_v9 = vpop.f32.mrb[31].mxu1  ;;  %v4219_v6 = vadd.f32 %v4186_v46, %v3986_v50  ;;  %v2902_v58 = vpop.f32.mrb[31].mxu0 }
 0x213   : > { %v3039_v3 = vadd.f32 %v3038_v51, %v3008_v26  ;;  %v4220_v7 = vadd.f32 %v2902_v58, %v1820_v9  ;;  %v2971_v8 = vadd.f32 %v4217_v25, %v2970_v52 }
 0x214   : > { %v3011_v53 = vmul.f32 %v4219_v6, %v4219_v6 }
 0x215   : > { %v2972_v22 = vadd.f32 %v4220_v7, %v2971_v8  ;;  %v3010_v28 = vmul.f32 %v4220_v7, %v4220_v7  ;;  %v3040_v29 = vadd.f32 %v3039_v3, %v3009_v59 }
 0x217   : > { %v2973_v55 = vadd.f32 %v4219_v6, %v2972_v22  ;;  %v3041_v21 = vadd.f32 %v3040_v29, %v3010_v28 }
 0x219   : > { %v2974_v24 = vrot.slane %v2973_v55, 4  ;;  %v3042_v10 = vadd.f32 %v3041_v21, %v3011_v53 }
 0x21b   : > { %v2975_v12 = vadd.f32 %v2974_v24, %v2973_v55  ;;  %v3043_v40 = vrot.slane %v3042_v10, 4 }
 0x21d   : > { %v2976_v20 = vrot.slane %v2975_v12, 2  ;;  %v3044_v54 = vadd.f32 %v3043_v40, %v3042_v10 }
 0x21f   : > { %v2977_v19 = vadd.f32 %v2976_v20, %v2975_v12  ;;  %v3045_v13 = vrot.slane %v3044_v54, 2 }
 0x221   : > { %v2978_v39 = vrot.slane %v2977_v19, 1  ;;  %v3046_v41 = vadd.f32 %v3045_v13, %v3044_v54 }
 0x223   : > { %v3047_v17 = vrot.slane %v3046_v41, 1  ;;  %v2979_v61 = vadd.f32 %v2978_v39, %v2977_v19 }
 0x225   : > { %v3048_v33 = vadd.f32 %v3047_v17, %v3046_v41 }
 0x227   : > { %v3050_v48 = vsel %vm3049_vm4, %v2979_v61, %v3048_v33 }
 0x228   : > { %3051 = vst [vmem:[%s136_s28] sm:$0x3] %v3050_v48 }
 0x229   : > { %4498 = shalt.err (!%p4495_p3)
}
 0x22a   : > { %s4499_s14 = scalar_lea.hbm %s5734_s4, 32  ;;  %s4503_s21 = scalar_lea.hbm %s5778_s2, 64 }
 0x22b   : > { %p4500_p4 = scmp.ne.s32.totalorder %s5734_s4, %s4499_s14  ;;  %p4504_p9 = scmp.lt.u32.totalorder %s5734_s4, %s5778_s2 }
 0x22c   : > { %p4505_p10 = scmp.lt.u32.totalorder %s4503_s21, %s4499_s14  ;;  %p4507_p12 = scmp.lt.u32.totalorder %s4499_s14, %s5734_s4 }
 0x22d   : > { %p4501_p7 = pnand %p4500_p4, %p4603_p5 }
 0x22e   : > { %p4506_p11 = por %p4505_p10, %p4504_p9 }
 0x22f   : > { %p4502_p8 = pneg %p4501_p7 }
 0x230   : > { %p4508_p13 = por %p4507_p12, %p4506_p11 }
 0x232   : > { %p4509_p0 = pnand %p4508_p13, %p4502_p8 }
 0x234   : > { %4512 = shalt.err (!%p4509_p0)
}
 0x235   : > { %4446 = dma.vmem_to_hbm [thread:$0]  (%p4603_p5), %s5736_s29, 32, %s5734_s4, %s3053_s5  }
 0x236 PF: > { %p4452_p1 = scmp.ge.s32.totalorder %s4547_s12, 2  ;;  %s3078_s24 = sand.u32 1, %s4535_s9  }
 0x237   : > { %s3079_s25 = scalar_lea.sflag [#allocation3], %s3078_s24 }
 0x238   : > { %p4449_p2 = pnand %p4452_p1, %p4607_p6 }
 0x23a   : > { %4530 = dma.done.wait (!%p4449_p2), %s3079_s25, 32  }
 0x23b   : > { %4532 = vsyncadd (!%p4449_p2), %s3079_s25, 4294967264  ;;  %p12_p3 = scmp.ge.s32.totalorder %s4590_s15, 4   ;;  %s5955_s9 = smov %s4539_s10 }
 0x23c   : > { %s5956_s10 = smov %s4543_s11  ;;  %s5957_s11 = smov %s4601_s18 }
 0x23d   : > { %s5958_s12 = smov %s4590_s15  ;;  %14 = sbr.rel (!%p12_p3) target bundleno = 3 (0x3), region = 71 }
 0x244   :  { %3084 = vsyncpa [#allocation3], 1 }
 0x245   :  { %3086 = vsyncpa [#allocation3 + $0x1], 1 }

</bundles_post_ra>
